<compile_context>
chip_gen: v7x
topology: tpu7x:2x2x1
jax: 0.10.0
libtpu: 0.0.40
codegen_flags: <defaults>
</compile_context>

<pallas_src>
import functools

import jax
import jax.numpy as jnp
from jax import lax
from jax.experimental import pallas as pl
from jax.experimental.pallas import tpu as pltpu


def _vmem_limit_bytes():
    """Generation-aware scoped-VMEM limit with ~25% headroom for compiler
    scratch / pipeline buffers (v7x has only 64 MiB physical per TC)."""
    try:
        cap = pltpu.get_tpu_info().vmem_capacity_bytes
    except Exception:
        cap = 64 * 1024 * 1024  # conservative: v7x physical per-TC VMEM
    return int(cap) * 3 // 4


def _encoder_kernel(B, B_pad,
                    x_ref,
                    w1_ref, gb1_ref,
                    w2_ref, gb2_ref,
                    w3_ref, gb3_ref,
                    wh_ref, bh_ref,
                    o_ref):
    """Fused trunk (3x Conv1d(k=3,pad=1) + BN(batch stats) + ELU) + Linear head.

    Activation layout: (N, C) with N = L * B_pad rows ordered r = l*B_pad + b,
    channels on the lane axis.  Rows with b >= B are sublane padding.
    """
    N = x_ref.shape[0]           # N = L * B_pad
    L = N // B_pad
    inv_n = 1.0 / (B * L)        # BN statistics count only the real rows

    # Row-validity mask: pad rows (b >= B) must not contribute to BN stats
    # (after layer 1 they are nonzero).  Computed once, reused by all layers.
    row = lax.broadcasted_iota(jnp.int32, (N, 1), 0)
    mask = ((row % B_pad) < B).astype(jnp.float32)

    def conv_bn_elu(h, w_ref, gb_ref):
        cin = h.shape[1]
        zpad = jnp.zeros((B_pad, cin), jnp.float32)
        # +-1 conv taps = zero-padded whole-slab shifts along l (rows l*B_pad+b);
        # sublane-aligned because B_pad is a multiple of 8, no cross-example
        # leakage because the shift preserves b within each slab.
        h_prev = jnp.concatenate([zpad, h[:N - B_pad]], axis=0)
        h_next = jnp.concatenate([h[B_pad:], zpad], axis=0)
        # Three accumulated MXU dots (no lane concatenation of the taps).
        # NOTE: on v6e/v7x the dot operands could be cast to bf16 (keep f32
        # accumulation and f32 BN/ELU); kept f32 for tight numerical agreement.
        y = jnp.dot(h_prev, w_ref[0], preferred_element_type=jnp.float32)
        y = y + jnp.dot(h, w_ref[1], preferred_element_type=jnp.float32)
        y = y + jnp.dot(h_next, w_ref[2], preferred_element_type=jnp.float32)
        # Conv bias omitted: BatchNorm with batch statistics subtracts the
        # per-channel mean, which cancels any per-channel constant exactly.
        # BatchNorm1d(track_running_stats=False): batch statistics (biased
        # variance, eps=1e-5) over real (b, l) positions only, one pass.
        ym = y * mask
        s = jnp.sum(ym, axis=0, keepdims=True)
        s2 = jnp.sum(ym * y, axis=0, keepdims=True)
        mean = s * inv_n
        var = jnp.maximum(s2 * inv_n - mean * mean, 0.0)
        gamma = gb_ref[0:1, :]
        beta = gb_ref[1:2, :]
        yn = (y - mean) * lax.rsqrt(var + 1e-5) * gamma + beta
        # ELU(alpha=1), overflow-safe on the untaken branch.
        return jnp.where(yn > 0, yn, jnp.exp(jnp.minimum(yn, 0.0)) - 1.0)

    h = conv_bn_elu(x_ref[...], w1_ref, gb1_ref)
    h = conv_bn_elu(h, w2_ref, gb2_ref)
    h = conv_bn_elu(h, w3_ref, gb3_ref)

    # Fused Linear head.  PyTorch's trunk.view(bs, -1) flattens as c*L + l; the
    # head weight is pre-permuted at init to (L, C3, D_pad), so the flatten +
    # matmul becomes an accumulated sum of per-position dots — pure MXU work,
    # no lane concatenation, one f32 accumulator.  Output lanes are padded to a
    # multiple of 128 (lane-dense stores); pad rows/lanes sliced off outside.
    Dp = o_ref.shape[1]
    acc = jnp.zeros((B_pad, Dp), jnp.float32)
    for l in range(L):
        acc = acc + jnp.dot(h[l * B_pad:(l + 1) * B_pad, :], wh_ref[l],
                            preferred_element_type=jnp.float32)
    o_ref[...] = acc + bh_ref[...]


def init_params(key, in_channel, in_dim, out_dim):
    """PyTorch-layout parameters (also consumed by the pure-JAX reference)."""
    keys = jax.random.split(key, 14)
    layers = []
    cin = in_channel
    ki = 0
    for mult in (2, 4, 8):
        cout = mult * in_channel
        W = 0.1 * jax.random.normal(keys[ki], (cout, cin, 3), jnp.float32); ki += 1
        b = 0.1 * jax.random.normal(keys[ki], (cout,), jnp.float32); ki += 1
        g = 1.0 + 0.1 * jax.random.normal(keys[ki], (cout,), jnp.float32); ki += 1
        be = 0.1 * jax.random.normal(keys[ki], (cout,), jnp.float32); ki += 1
        layers.append((W, b, g, be))
        cin = cout
    Wh = 0.05 * jax.random.normal(keys[ki], (out_dim, 8 * in_channel * in_dim),
                                  jnp.float32); ki += 1
    bh = 0.1 * jax.random.normal(keys[ki], (out_dim,), jnp.float32)
    return {"layers": layers, "Wh": Wh, "bh": bh}


def to_kernel_params(params, lane=128):
    """One-time conversion to kernel layouts (done at init, not per call)."""
    layers = []
    for (W, b, g, be) in params["layers"]:
        # (cout, cin, 3) -> (3, cin, cout): tap k indexed on the leading axis.
        Wk = jnp.transpose(W, (2, 1, 0)).astype(jnp.float32)
        # gamma/beta packed into one (2, cout) array.  Conv bias b is dropped:
        # BN batch-mean subtraction cancels it exactly.
        gb = jnp.stack([g, be], axis=0).astype(jnp.float32)
        layers.append((Wk, gb))
    c3 = params["layers"][-1][0].shape[0]
    D, K = params["Wh"].shape
    L = K // c3
    Dp = ((D + lane - 1) // lane) * lane
    # Wh[d, c*L + l] -> Whk[l, c, d] to match the kernel's per-position dots;
    # pad the output lane dim to a multiple of 128 (lane-dense stores).
    Whk = jnp.transpose(params["Wh"].reshape(D, c3, L), (2, 1, 0))   # (L, c3, D)
    Whk = jnp.pad(Whk, ((0, 0), (0, 0), (0, Dp - D))).astype(jnp.float32)
    bh = jnp.pad(params["bh"], ((0, Dp - D),))[None, :].astype(jnp.float32)
    return {"layers": layers, "Whk": Whk, "bh": bh}


def conv_encoder_forward(x, kparams, out_dim):
    """x: (B, C, L) as in the PyTorch module; kparams from to_kernel_params;
    out_dim: the (static) un-padded head output width."""
    B, C, L = x.shape
    B_pad = ((B + 7) // 8) * 8   # sublane-align the batch; pad rows are masked

    # Glue: NCL -> (L*B_pad, C), rows ordered l*B_pad + b.
    # When a row-block grid is added for large B*L, this transpose should be
    # absorbed into the first layer's BlockSpec index_map instead.
    xt = jnp.transpose(x, (2, 0, 1))                       # (L, B, C)
    if B_pad != B:
        xt = jnp.pad(xt, ((0, 0), (0, B_pad - B), (0, 0)))
    xr = xt.reshape(L * B_pad, C).astype(jnp.float32)

    args = [xr]
    for (Wk, gb) in kparams["layers"]:
        args.append(Wk)
        args.append(gb)
    args.append(kparams["Whk"])
    args.append(kparams["bh"])
    Dp = kparams["Whk"].shape[2]

    vmem = pl.BlockSpec(memory_space=pltpu.MemorySpace.VMEM)
    # Single grid point: whole problem is VMEM resident (N = L*B_pad rows is
    # tiny here).  For large B*L, tile rows with a grid ('arbitrary' reduction
    # handling for BN, 'parallel' split over v7x's two TensorCores with partial
    # BN sums) — unnecessary at these sizes.
    out = pl.pallas_call(
        functools.partial(_encoder_kernel, B, B_pad),
        out_shape=jax.ShapeDtypeStruct((B_pad, Dp), jnp.float32),
        in_specs=[vmem] * len(args),
        out_specs=vmem,
        compiler_params=pltpu.CompilerParams(
            vmem_limit_bytes=_vmem_limit_bytes()),
    )(*args)
    return out[:B, :out_dim]


def ref_forward(x, params):
    """Pure-JAX reference matching the PyTorch module semantics."""
    h = x
    for (W, b, g, be) in params["layers"]:
        L = h.shape[2]
        xp = jnp.pad(h, ((0, 0), (0, 0), (1, 1)))
        y = sum(jnp.einsum("bcl,oc->bol", xp[:, :, k:k + L], W[:, :, k])
                for k in range(3)) + b[None, :, None]
        mean = y.mean(axis=(0, 2), keepdims=True)
        var = jnp.square(y - mean).mean(axis=(0, 2), keepdims=True)
        yn = (y - mean) / jnp.sqrt(var + 1e-5) * g[None, :, None] + be[None, :, None]
        h = jnp.where(yn > 0, yn, jnp.exp(jnp.minimum(yn, 0.0)) - 1.0)
    flat = h.reshape(h.shape[0], -1)
    return flat @ params["Wh"].T + params["bh"]


if __name__ == "__main__":
    B, C, L, D = 2, 4, 16, 32  # batch, in_channel, in_dim (length), out_dim
    key = jax.random.PRNGKey(0)
    kx, kp = jax.random.split(key)
    x = jax.random.normal(kx, (B, C, L), jnp.float32)
    params = init_params(kp, C, L, D)
    kparams = to_kernel_params(params)     # one-time layout conversion

    fwd = jax.jit(conv_encoder_forward, static_argnums=(2,))
    out = fwd(x, kparams, D)
    out = jax.block_until_ready(out)

    ref = ref_forward(x, params)
    assert out.shape == (B, D), out.shape
    assert jnp.allclose(out, ref, rtol=2e-3, atol=2e-3), \
        float(jnp.max(jnp.abs(out - ref)))
    print("KERNEL_OK")
</pallas_src>

<mosaic_0001>
module attributes {stable_mosaic.version = 11 : i64} {
  func.func @_encoder_kernel(%arg0: memref<128x4xf32, #tpu.memory_space<vmem>>, %arg1: memref<3x4x8xf32, #tpu.memory_space<vmem>>, %arg2: memref<2x8xf32, #tpu.memory_space<vmem>>, %arg3: memref<3x8x16xf32, #tpu.memory_space<vmem>>, %arg4: memref<2x16xf32, #tpu.memory_space<vmem>>, %arg5: memref<3x16x32xf32, #tpu.memory_space<vmem>>, %arg6: memref<2x32xf32, #tpu.memory_space<vmem>>, %arg7: memref<16x32x128xf32, #tpu.memory_space<vmem>>, %arg8: memref<1x128xf32, #tpu.memory_space<vmem>>, %arg9: memref<8x128xf32, #tpu.memory_space<vmem>>) attributes {dimension_semantics = [], scalar_prefetch = 0 : i64, scratch_operands = 0 : i64, tpu.core_type = #tpu.core_type<tc>} {
    %0 = tpu.iota {dimensions = array<i32: 0>} : vector<128x1xi32>
    %c8_i32 = arith.constant 8 : i32
    %c0_i32 = arith.constant 0 : i32
    %1 = arith.cmpi eq, %c8_i32, %c0_i32 : i32
    %c1_i32 = arith.constant 1 : i32
    %2 = arith.select %1, %c1_i32, %c8_i32 : i32
    %3 = vector.broadcast %2 : i32 to vector<128x1xi32>
    %4 = arith.remsi %0, %3 : vector<128x1xi32>
    %c0_i32_0 = arith.constant 0 : i32
    %5 = vector.broadcast %c0_i32_0 : i32 to vector<128x1xi32>
    %6 = arith.cmpi ne, %4, %5 : vector<128x1xi32>
    %c0_i32_1 = arith.constant 0 : i32
    %7 = vector.broadcast %c0_i32_1 : i32 to vector<128x1xi32>
    %8 = arith.cmpi slt, %4, %7 : vector<128x1xi32>
    %c0_i32_2 = arith.constant 0 : i32
    %9 = arith.cmpi slt, %2, %c0_i32_2 : i32
    %10 = vector.broadcast %9 : i1 to vector<128x1xi1>
    %11 = vector.broadcast %10 : vector<128x1xi1> to vector<128x1xi1>
    %12 = arith.xori %8, %11 : vector<128x1xi1>
    %13 = arith.andi %12, %6 : vector<128x1xi1>
    %14 = vector.broadcast %2 : i32 to vector<128x1xi32>
    %15 = arith.addi %4, %14 : vector<128x1xi32>
    %16 = arith.select %13, %15, %4 : vector<128x1xi1>, vector<128x1xi32>
    %c2_i32 = arith.constant 2 : i32
    %17 = vector.broadcast %c2_i32 : i32 to vector<128x1xi32>
    %18 = arith.cmpi slt, %16, %17 : vector<128x1xi32>
    %19 = arith.extui %18 : vector<128x1xi1> to vector<128x1xi32>
    %20 = arith.sitofp %19 : vector<128x1xi32> to vector<128x1xf32>
    %c0 = arith.constant 0 : index
    %c0_3 = arith.constant 0 : index
    %21 = vector.load %arg0[%c0, %c0_3] : memref<128x4xf32, #tpu.memory_space<vmem>>, vector<128x4xf32>
    %cst = arith.constant 0.000000e+00 : f32
    %22 = vector.broadcast %cst : f32 to vector<8x4xf32>
    %23 = vector.extract_strided_slice %21 {offsets = [0, 0], sizes = [120, 4], strides = [1, 1]} : vector<128x4xf32> to vector<120x4xf32>
    %24 = tpu.concatenate %22, %23 in 0 : vector<8x4xf32>, vector<120x4xf32> -> vector<128x4xf32>
    %25 = vector.extract_strided_slice %21 {offsets = [8, 0], sizes = [120, 4], strides = [1, 1]} : vector<128x4xf32> to vector<120x4xf32>
    %26 = tpu.concatenate %25, %22 in 0 : vector<120x4xf32>, vector<8x4xf32> -> vector<128x4xf32>
    %c0_4 = arith.constant 0 : index
    %c0_5 = arith.constant 0 : index
    %c0_6 = arith.constant 0 : index
    %27 = vector.load %arg1[%c0_4, %c0_5, %c0_6] : memref<3x4x8xf32, #tpu.memory_space<vmem>>, vector<1x4x8xf32>
    %28 = vector.shape_cast %27 : vector<1x4x8xf32> to vector<4x8xf32>
    %cst_7 = arith.constant dense<0.000000e+00> : vector<128x8xf32>
    %29 = tpu.matmul %24, %28, %cst_7 {dimension_numbers = #tpu.dot_dimension_numbers<[1], [0], [0], [1], [0, 0, 1, 1], [], []>} : vector<128x4xf32>, vector<4x8xf32>, vector<128x8xf32> -> vector<128x8xf32>
    %c1 = arith.constant 1 : index
    %c0_8 = arith.constant 0 : index
    %c0_9 = arith.constant 0 : index
    %30 = vector.load %arg1[%c1, %c0_8, %c0_9] : memref<3x4x8xf32, #tpu.memory_space<vmem>>, vector<1x4x8xf32>
    %31 = vector.shape_cast %30 : vector<1x4x8xf32> to vector<4x8xf32>
    %cst_10 = arith.constant dense<0.000000e+00> : vector<128x8xf32>
    %32 = tpu.matmul %21, %31, %cst_10 {dimension_numbers = #tpu.dot_dimension_numbers<[1], [0], [0], [1], [0, 0, 1, 1], [], []>} : vector<128x4xf32>, vector<4x8xf32>, vector<128x8xf32> -> vector<128x8xf32>
    %33 = arith.addf %29, %32 : vector<128x8xf32>
    %c2 = arith.constant 2 : index
    %c0_11 = arith.constant 0 : index
    %c0_12 = arith.constant 0 : index
    %34 = vector.load %arg1[%c2, %c0_11, %c0_12] : memref<3x4x8xf32, #tpu.memory_space<vmem>>, vector<1x4x8xf32>
    %35 = vector.shape_cast %34 : vector<1x4x8xf32> to vector<4x8xf32>
    %cst_13 = arith.constant dense<0.000000e+00> : vector<128x8xf32>
    %36 = tpu.matmul %26, %35, %cst_13 {dimension_numbers = #tpu.dot_dimension_numbers<[1], [0], [0], [1], [0, 0, 1, 1], [], []>} : vector<128x4xf32>, vector<4x8xf32>, vector<128x8xf32> -> vector<128x8xf32>
    %37 = arith.addf %33, %36 : vector<128x8xf32>
    %38 = vector.broadcast %20 : vector<128x1xf32> to vector<128x8xf32>
    %39 = arith.mulf %37, %38 : vector<128x8xf32>
    %cst_14 = arith.constant dense<0.000000e+00> : vector<8xf32>
    %40 = vector.multi_reduction <add>, %39, %cst_14 [0] : vector<128x8xf32> to vector<8xf32>
    %41 = vector.shape_cast %40 : vector<8xf32> to vector<1x8xf32>
    %42 = arith.mulf %39, %37 : vector<128x8xf32>
    %cst_15 = arith.constant dense<0.000000e+00> : vector<8xf32>
    %43 = vector.multi_reduction <add>, %42, %cst_15 [0] : vector<128x8xf32> to vector<8xf32>
    %44 = vector.shape_cast %43 : vector<8xf32> to vector<1x8xf32>
    %cst_16 = arith.constant 3.125000e-02 : f32
    %45 = vector.broadcast %cst_16 : f32 to vector<1x8xf32>
    %46 = arith.mulf %41, %45 : vector<1x8xf32>
    %cst_17 = arith.constant 3.125000e-02 : f32
    %47 = vector.broadcast %cst_17 : f32 to vector<1x8xf32>
    %48 = arith.mulf %44, %47 : vector<1x8xf32>
    %49 = arith.mulf %46, %46 : vector<1x8xf32>
    %50 = arith.subf %48, %49 : vector<1x8xf32>
    %cst_18 = arith.constant 0.000000e+00 : f32
    %51 = vector.broadcast %cst_18 : f32 to vector<1x8xf32>
    %52 = arith.maximumf %50, %51 : vector<1x8xf32>
    %c0_19 = arith.constant 0 : index
    %c0_20 = arith.constant 0 : index
    %53 = vector.load %arg2[%c0_19, %c0_20] : memref<2x8xf32, #tpu.memory_space<vmem>>, vector<1x8xf32>
    %c1_21 = arith.constant 1 : index
    %c0_22 = arith.constant 0 : index
    %54 = vector.load %arg2[%c1_21, %c0_22] : memref<2x8xf32, #tpu.memory_space<vmem>>, vector<1x8xf32>
    %55 = vector.broadcast %46 : vector<1x8xf32> to vector<128x8xf32>
    %56 = arith.subf %37, %55 : vector<128x8xf32>
    %cst_23 = arith.constant 9.99999974E-6 : f32
    %57 = vector.broadcast %cst_23 : f32 to vector<1x8xf32>
    %58 = arith.addf %52, %57 : vector<1x8xf32>
    %59 = math.rsqrt %58 : vector<1x8xf32>
    %60 = vector.broadcast %59 : vector<1x8xf32> to vector<128x8xf32>
    %61 = arith.mulf %56, %60 : vector<128x8xf32>
    %62 = vector.broadcast %53 : vector<1x8xf32> to vector<128x8xf32>
    %63 = arith.mulf %61, %62 : vector<128x8xf32>
    %64 = vector.broadcast %54 : vector<1x8xf32> to vector<128x8xf32>
    %65 = arith.addf %63, %64 : vector<128x8xf32>
    %cst_24 = arith.constant 0.000000e+00 : f32
    %66 = vector.broadcast %cst_24 : f32 to vector<128x8xf32>
    %67 = arith.cmpf ogt, %65, %66 : vector<128x8xf32>
    %cst_25 = arith.constant 0.000000e+00 : f32
    %68 = vector.broadcast %cst_25 : f32 to vector<128x8xf32>
    %69 = arith.minimumf %65, %68 : vector<128x8xf32>
    %70 = math.exp %69 : vector<128x8xf32>
    %cst_26 = arith.constant 1.000000e+00 : f32
    %71 = vector.broadcast %cst_26 : f32 to vector<128x8xf32>
    %72 = arith.subf %70, %71 : vector<128x8xf32>
    %73 = arith.select %67, %65, %72 : vector<128x8xi1>, vector<128x8xf32>
    %cst_27 = arith.constant 0.000000e+00 : f32
    %74 = vector.broadcast %cst_27 : f32 to vector<8x8xf32>
    %75 = vector.extract_strided_slice %73 {offsets = [0, 0], sizes = [120, 8], strides = [1, 1]} : vector<128x8xf32> to vector<120x8xf32>
    %76 = tpu.concatenate %74, %75 in 0 : vector<8x8xf32>, vector<120x8xf32> -> vector<128x8xf32>
    %77 = vector.extract_strided_slice %73 {offsets = [8, 0], sizes = [120, 8], strides = [1, 1]} : vector<128x8xf32> to vector<120x8xf32>
    %78 = tpu.concatenate %77, %74 in 0 : vector<120x8xf32>, vector<8x8xf32> -> vector<128x8xf32>
    %c0_28 = arith.constant 0 : index
    %c0_29 = arith.constant 0 : index
    %c0_30 = arith.constant 0 : index
    %79 = vector.load %arg3[%c0_28, %c0_29, %c0_30] : memref<3x8x16xf32, #tpu.memory_space<vmem>>, vector<1x8x16xf32>
    %80 = vector.shape_cast %79 : vector<1x8x16xf32> to vector<8x16xf32>
    %cst_31 = arith.constant dense<0.000000e+00> : vector<128x16xf32>
    %81 = tpu.matmul %76, %80, %cst_31 {dimension_numbers = #tpu.dot_dimension_numbers<[1], [0], [0], [1], [0, 0, 1, 1], [], []>} : vector<128x8xf32>, vector<8x16xf32>, vector<128x16xf32> -> vector<128x16xf32>
    %c1_32 = arith.constant 1 : index
    %c0_33 = arith.constant 0 : index
    %c0_34 = arith.constant 0 : index
    %82 = vector.load %arg3[%c1_32, %c0_33, %c0_34] : memref<3x8x16xf32, #tpu.memory_space<vmem>>, vector<1x8x16xf32>
    %83 = vector.shape_cast %82 : vector<1x8x16xf32> to vector<8x16xf32>
    %cst_35 = arith.constant dense<0.000000e+00> : vector<128x16xf32>
    %84 = tpu.matmul %73, %83, %cst_35 {dimension_numbers = #tpu.dot_dimension_numbers<[1], [0], [0], [1], [0, 0, 1, 1], [], []>} : vector<128x8xf32>, vector<8x16xf32>, vector<128x16xf32> -> vector<128x16xf32>
    %85 = arith.addf %81, %84 : vector<128x16xf32>
    %c2_36 = arith.constant 2 : index
    %c0_37 = arith.constant 0 : index
    %c0_38 = arith.constant 0 : index
    %86 = vector.load %arg3[%c2_36, %c0_37, %c0_38] : memref<3x8x16xf32, #tpu.memory_space<vmem>>, vector<1x8x16xf32>
    %87 = vector.shape_cast %86 : vector<1x8x16xf32> to vector<8x16xf32>
    %cst_39 = arith.constant dense<0.000000e+00> : vector<128x16xf32>
    %88 = tpu.matmul %78, %87, %cst_39 {dimension_numbers = #tpu.dot_dimension_numbers<[1], [0], [0], [1], [0, 0, 1, 1], [], []>} : vector<128x8xf32>, vector<8x16xf32>, vector<128x16xf32> -> vector<128x16xf32>
    %89 = arith.addf %85, %88 : vector<128x16xf32>
    %90 = vector.broadcast %20 : vector<128x1xf32> to vector<128x16xf32>
    %91 = arith.mulf %89, %90 : vector<128x16xf32>
    %cst_40 = arith.constant dense<0.000000e+00> : vector<16xf32>
    %92 = vector.multi_reduction <add>, %91, %cst_40 [0] : vector<128x16xf32> to vector<16xf32>
    %93 = vector.shape_cast %92 : vector<16xf32> to vector<1x16xf32>
    %94 = arith.mulf %91, %89 : vector<128x16xf32>
    %cst_41 = arith.constant dense<0.000000e+00> : vector<16xf32>
    %95 = vector.multi_reduction <add>, %94, %cst_41 [0] : vector<128x16xf32> to vector<16xf32>
    %96 = vector.shape_cast %95 : vector<16xf32> to vector<1x16xf32>
    %cst_42 = arith.constant 3.125000e-02 : f32
    %97 = vector.broadcast %cst_42 : f32 to vector<1x16xf32>
    %98 = arith.mulf %93, %97 : vector<1x16xf32>
    %cst_43 = arith.constant 3.125000e-02 : f32
    %99 = vector.broadcast %cst_43 : f32 to vector<1x16xf32>
    %100 = arith.mulf %96, %99 : vector<1x16xf32>
    %101 = arith.mulf %98, %98 : vector<1x16xf32>
    %102 = arith.subf %100, %101 : vector<1x16xf32>
    %cst_44 = arith.constant 0.000000e+00 : f32
    %103 = vector.broadcast %cst_44 : f32 to vector<1x16xf32>
    %104 = arith.maximumf %102, %103 : vector<1x16xf32>
    %c0_45 = arith.constant 0 : index
    %c0_46 = arith.constant 0 : index
    %105 = vector.load %arg4[%c0_45, %c0_46] : memref<2x16xf32, #tpu.memory_space<vmem>>, vector<1x16xf32>
    %c1_47 = arith.constant 1 : index
    %c0_48 = arith.constant 0 : index
    %106 = vector.load %arg4[%c1_47, %c0_48] : memref<2x16xf32, #tpu.memory_space<vmem>>, vector<1x16xf32>
    %107 = vector.broadcast %98 : vector<1x16xf32> to vector<128x16xf32>
    %108 = arith.subf %89, %107 : vector<128x16xf32>
    %cst_49 = arith.constant 9.99999974E-6 : f32
    %109 = vector.broadcast %cst_49 : f32 to vector<1x16xf32>
    %110 = arith.addf %104, %109 : vector<1x16xf32>
    %111 = math.rsqrt %110 : vector<1x16xf32>
    %112 = vector.broadcast %111 : vector<1x16xf32> to vector<128x16xf32>
    %113 = arith.mulf %108, %112 : vector<128x16xf32>
    %114 = vector.broadcast %105 : vector<1x16xf32> to vector<128x16xf32>
    %115 = arith.mulf %113, %114 : vector<128x16xf32>
    %116 = vector.broadcast %106 : vector<1x16xf32> to vector<128x16xf32>
    %117 = arith.addf %115, %116 : vector<128x16xf32>
    %cst_50 = arith.constant 0.000000e+00 : f32
    %118 = vector.broadcast %cst_50 : f32 to vector<128x16xf32>
    %119 = arith.cmpf ogt, %117, %118 : vector<128x16xf32>
    %cst_51 = arith.constant 0.000000e+00 : f32
    %120 = vector.broadcast %cst_51 : f32 to vector<128x16xf32>
    %121 = arith.minimumf %117, %120 : vector<128x16xf32>
    %122 = math.exp %121 : vector<128x16xf32>
    %cst_52 = arith.constant 1.000000e+00 : f32
    %123 = vector.broadcast %cst_52 : f32 to vector<128x16xf32>
    %124 = arith.subf %122, %123 : vector<128x16xf32>
    %125 = arith.select %119, %117, %124 : vector<128x16xi1>, vector<128x16xf32>
    %cst_53 = arith.constant 0.000000e+00 : f32
    %126 = vector.broadcast %cst_53 : f32 to vector<8x16xf32>
    %127 = vector.extract_strided_slice %125 {offsets = [0, 0], sizes = [120, 16], strides = [1, 1]} : vector<128x16xf32> to vector<120x16xf32>
    %128 = tpu.concatenate %126, %127 in 0 : vector<8x16xf32>, vector<120x16xf32> -> vector<128x16xf32>
    %129 = vector.extract_strided_slice %125 {offsets = [8, 0], sizes = [120, 16], strides = [1, 1]} : vector<128x16xf32> to vector<120x16xf32>
    %130 = tpu.concatenate %129, %126 in 0 : vector<120x16xf32>, vector<8x16xf32> -> vector<128x16xf32>
    %c0_54 = arith.constant 0 : index
    %c0_55 = arith.constant 0 : index
    %c0_56 = arith.constant 0 : index
    %131 = vector.load %arg5[%c0_54, %c0_55, %c0_56] : memref<3x16x32xf32, #tpu.memory_space<vmem>>, vector<1x16x32xf32>
    %132 = vector.shape_cast %131 : vector<1x16x32xf32> to vector<16x32xf32>
    %cst_57 = arith.constant dense<0.000000e+00> : vector<128x32xf32>
    %133 = tpu.matmul %128, %132, %cst_57 {dimension_numbers = #tpu.dot_dimension_numbers<[1], [0], [0], [1], [0, 0, 1, 1], [], []>} : vector<128x16xf32>, vector<16x32xf32>, vector<128x32xf32> -> vector<128x32xf32>
    %c1_58 = arith.constant 1 : index
    %c0_59 = arith.constant 0 : index
    %c0_60 = arith.constant 0 : index
    %134 = vector.load %arg5[%c1_58, %c0_59, %c0_60] : memref<3x16x32xf32, #tpu.memory_space<vmem>>, vector<1x16x32xf32>
    %135 = vector.shape_cast %134 : vector<1x16x32xf32> to vector<16x32xf32>
    %cst_61 = arith.constant dense<0.000000e+00> : vector<128x32xf32>
    %136 = tpu.matmul %125, %135, %cst_61 {dimension_numbers = #tpu.dot_dimension_numbers<[1], [0], [0], [1], [0, 0, 1, 1], [], []>} : vector<128x16xf32>, vector<16x32xf32>, vector<128x32xf32> -> vector<128x32xf32>
    %137 = arith.addf %133, %136 : vector<128x32xf32>
    %c2_62 = arith.constant 2 : index
    %c0_63 = arith.constant 0 : index
    %c0_64 = arith.constant 0 : index
    %138 = vector.load %arg5[%c2_62, %c0_63, %c0_64] : memref<3x16x32xf32, #tpu.memory_space<vmem>>, vector<1x16x32xf32>
    %139 = vector.shape_cast %138 : vector<1x16x32xf32> to vector<16x32xf32>
    %cst_65 = arith.constant dense<0.000000e+00> : vector<128x32xf32>
    %140 = tpu.matmul %130, %139, %cst_65 {dimension_numbers = #tpu.dot_dimension_numbers<[1], [0], [0], [1], [0, 0, 1, 1], [], []>} : vector<128x16xf32>, vector<16x32xf32>, vector<128x32xf32> -> vector<128x32xf32>
    %141 = arith.addf %137, %140 : vector<128x32xf32>
    %142 = vector.broadcast %20 : vector<128x1xf32> to vector<128x32xf32>
    %143 = arith.mulf %141, %142 : vector<128x32xf32>
    %cst_66 = arith.constant dense<0.000000e+00> : vector<32xf32>
    %144 = vector.multi_reduction <add>, %143, %cst_66 [0] : vector<128x32xf32> to vector<32xf32>
    %145 = vector.shape_cast %144 : vector<32xf32> to vector<1x32xf32>
    %146 = arith.mulf %143, %141 : vector<128x32xf32>
    %cst_67 = arith.constant dense<0.000000e+00> : vector<32xf32>
    %147 = vector.multi_reduction <add>, %146, %cst_67 [0] : vector<128x32xf32> to vector<32xf32>
    %148 = vector.shape_cast %147 : vector<32xf32> to vector<1x32xf32>
    %cst_68 = arith.constant 3.125000e-02 : f32
    %149 = vector.broadcast %cst_68 : f32 to vector<1x32xf32>
    %150 = arith.mulf %145, %149 : vector<1x32xf32>
    %cst_69 = arith.constant 3.125000e-02 : f32
    %151 = vector.broadcast %cst_69 : f32 to vector<1x32xf32>
    %152 = arith.mulf %148, %151 : vector<1x32xf32>
    %153 = arith.mulf %150, %150 : vector<1x32xf32>
    %154 = arith.subf %152, %153 : vector<1x32xf32>
    %cst_70 = arith.constant 0.000000e+00 : f32
    %155 = vector.broadcast %cst_70 : f32 to vector<1x32xf32>
    %156 = arith.maximumf %154, %155 : vector<1x32xf32>
    %c0_71 = arith.constant 0 : index
    %c0_72 = arith.constant 0 : index
    %157 = vector.load %arg6[%c0_71, %c0_72] : memref<2x32xf32, #tpu.memory_space<vmem>>, vector<1x32xf32>
    %c1_73 = arith.constant 1 : index
    %c0_74 = arith.constant 0 : index
    %158 = vector.load %arg6[%c1_73, %c0_74] : memref<2x32xf32, #tpu.memory_space<vmem>>, vector<1x32xf32>
    %159 = vector.broadcast %150 : vector<1x32xf32> to vector<128x32xf32>
    %160 = arith.subf %141, %159 : vector<128x32xf32>
    %cst_75 = arith.constant 9.99999974E-6 : f32
    %161 = vector.broadcast %cst_75 : f32 to vector<1x32xf32>
    %162 = arith.addf %156, %161 : vector<1x32xf32>
    %163 = math.rsqrt %162 : vector<1x32xf32>
    %164 = vector.broadcast %163 : vector<1x32xf32> to vector<128x32xf32>
    %165 = arith.mulf %160, %164 : vector<128x32xf32>
    %166 = vector.broadcast %157 : vector<1x32xf32> to vector<128x32xf32>
    %167 = arith.mulf %165, %166 : vector<128x32xf32>
    %168 = vector.broadcast %158 : vector<1x32xf32> to vector<128x32xf32>
    %169 = arith.addf %167, %168 : vector<128x32xf32>
    %cst_76 = arith.constant 0.000000e+00 : f32
    %170 = vector.broadcast %cst_76 : f32 to vector<128x32xf32>
    %171 = arith.cmpf ogt, %169, %170 : vector<128x32xf32>
    %cst_77 = arith.constant 0.000000e+00 : f32
    %172 = vector.broadcast %cst_77 : f32 to vector<128x32xf32>
    %173 = arith.minimumf %169, %172 : vector<128x32xf32>
    %174 = math.exp %173 : vector<128x32xf32>
    %cst_78 = arith.constant 1.000000e+00 : f32
    %175 = vector.broadcast %cst_78 : f32 to vector<128x32xf32>
    %176 = arith.subf %174, %175 : vector<128x32xf32>
    %177 = arith.select %171, %169, %176 : vector<128x32xi1>, vector<128x32xf32>
    %cst_79 = arith.constant 0.000000e+00 : f32
    %178 = vector.broadcast %cst_79 : f32 to vector<8x128xf32>
    %179 = vector.extract_strided_slice %177 {offsets = [0, 0], sizes = [8, 32], strides = [1, 1]} : vector<128x32xf32> to vector<8x32xf32>
    %c0_80 = arith.constant 0 : index
    %c0_81 = arith.constant 0 : index
    %c0_82 = arith.constant 0 : index
    %180 = vector.load %arg7[%c0_80, %c0_81, %c0_82] : memref<16x32x128xf32, #tpu.memory_space<vmem>>, vector<1x32x128xf32>
    %181 = vector.shape_cast %180 : vector<1x32x128xf32> to vector<32x128xf32>
    %cst_83 = arith.constant dense<0.000000e+00> : vector<8x128xf32>
    %182 = tpu.matmul %179, %181, %cst_83 {dimension_numbers = #tpu.dot_dimension_numbers<[1], [0], [0], [1], [0, 0, 1, 1], [], []>} : vector<8x32xf32>, vector<32x128xf32>, vector<8x128xf32> -> vector<8x128xf32>
    %183 = arith.addf %178, %182 : vector<8x128xf32>
    %184 = vector.extract_strided_slice %177 {offsets = [8, 0], sizes = [8, 32], strides = [1, 1]} : vector<128x32xf32> to vector<8x32xf32>
    %c1_84 = arith.constant 1 : index
    %c0_85 = arith.constant 0 : index
    %c0_86 = arith.constant 0 : index
    %185 = vector.load %arg7[%c1_84, %c0_85, %c0_86] : memref<16x32x128xf32, #tpu.memory_space<vmem>>, vector<1x32x128xf32>
    %186 = vector.shape_cast %185 : vector<1x32x128xf32> to vector<32x128xf32>
    %cst_87 = arith.constant dense<0.000000e+00> : vector<8x128xf32>
    %187 = tpu.matmul %184, %186, %cst_87 {dimension_numbers = #tpu.dot_dimension_numbers<[1], [0], [0], [1], [0, 0, 1, 1], [], []>} : vector<8x32xf32>, vector<32x128xf32>, vector<8x128xf32> -> vector<8x128xf32>
    %188 = arith.addf %183, %187 : vector<8x128xf32>
    %189 = vector.extract_strided_slice %177 {offsets = [16, 0], sizes = [8, 32], strides = [1, 1]} : vector<128x32xf32> to vector<8x32xf32>
    %c2_88 = arith.constant 2 : index
    %c0_89 = arith.constant 0 : index
    %c0_90 = arith.constant 0 : index
    %190 = vector.load %arg7[%c2_88, %c0_89, %c0_90] : memref<16x32x128xf32, #tpu.memory_space<vmem>>, vector<1x32x128xf32>
    %191 = vector.shape_cast %190 : vector<1x32x128xf32> to vector<32x128xf32>
    %cst_91 = arith.constant dense<0.000000e+00> : vector<8x128xf32>
    %192 = tpu.matmul %189, %191, %cst_91 {dimension_numbers = #tpu.dot_dimension_numbers<[1], [0], [0], [1], [0, 0, 1, 1], [], []>} : vector<8x32xf32>, vector<32x128xf32>, vector<8x128xf32> -> vector<8x128xf32>
    %193 = arith.addf %188, %192 : vector<8x128xf32>
    %194 = vector.extract_strided_slice %177 {offsets = [24, 0], sizes = [8, 32], strides = [1, 1]} : vector<128x32xf32> to vector<8x32xf32>
    %c3 = arith.constant 3 : index
    %c0_92 = arith.constant 0 : index
    %c0_93 = arith.constant 0 : index
    %195 = vector.load %arg7[%c3, %c0_92, %c0_93] : memref<16x32x128xf32, #tpu.memory_space<vmem>>, vector<1x32x128xf32>
    %196 = vector.shape_cast %195 : vector<1x32x128xf32> to vector<32x128xf32>
    %cst_94 = arith.constant dense<0.000000e+00> : vector<8x128xf32>
    %197 = tpu.matmul %194, %196, %cst_94 {dimension_numbers = #tpu.dot_dimension_numbers<[1], [0], [0], [1], [0, 0, 1, 1], [], []>} : vector<8x32xf32>, vector<32x128xf32>, vector<8x128xf32> -> vector<8x128xf32>
    %198 = arith.addf %193, %197 : vector<8x128xf32>
    %199 = vector.extract_strided_slice %177 {offsets = [32, 0], sizes = [8, 32], strides = [1, 1]} : vector<128x32xf32> to vector<8x32xf32>
    %c4 = arith.constant 4 : index
    %c0_95 = arith.constant 0 : index
    %c0_96 = arith.constant 0 : index
    %200 = vector.load %arg7[%c4, %c0_95, %c0_96] : memref<16x32x128xf32, #tpu.memory_space<vmem>>, vector<1x32x128xf32>
    %201 = vector.shape_cast %200 : vector<1x32x128xf32> to vector<32x128xf32>
    %cst_97 = arith.constant dense<0.000000e+00> : vector<8x128xf32>
    %202 = tpu.matmul %199, %201, %cst_97 {dimension_numbers = #tpu.dot_dimension_numbers<[1], [0], [0], [1], [0, 0, 1, 1], [], []>} : vector<8x32xf32>, vector<32x128xf32>, vector<8x128xf32> -> vector<8x128xf32>
    %203 = arith.addf %198, %202 : vector<8x128xf32>
    %204 = vector.extract_strided_slice %177 {offsets = [40, 0], sizes = [8, 32], strides = [1, 1]} : vector<128x32xf32> to vector<8x32xf32>
    %c5 = arith.constant 5 : index
    %c0_98 = arith.constant 0 : index
    %c0_99 = arith.constant 0 : index
    %205 = vector.load %arg7[%c5, %c0_98, %c0_99] : memref<16x32x128xf32, #tpu.memory_space<vmem>>, vector<1x32x128xf32>
    %206 = vector.shape_cast %205 : vector<1x32x128xf32> to vector<32x128xf32>
    %cst_100 = arith.constant dense<0.000000e+00> : vector<8x128xf32>
    %207 = tpu.matmul %204, %206, %cst_100 {dimension_numbers = #tpu.dot_dimension_numbers<[1], [0], [0], [1], [0, 0, 1, 1], [], []>} : vector<8x32xf32>, vector<32x128xf32>, vector<8x128xf32> -> vector<8x128xf32>
    %208 = arith.addf %203, %207 : vector<8x128xf32>
    %209 = vector.extract_strided_slice %177 {offsets = [48, 0], sizes = [8, 32], strides = [1, 1]} : vector<128x32xf32> to vector<8x32xf32>
    %c6 = arith.constant 6 : index
    %c0_101 = arith.constant 0 : index
    %c0_102 = arith.constant 0 : index
    %210 = vector.load %arg7[%c6, %c0_101, %c0_102] : memref<16x32x128xf32, #tpu.memory_space<vmem>>, vector<1x32x128xf32>
    %211 = vector.shape_cast %210 : vector<1x32x128xf32> to vector<32x128xf32>
    %cst_103 = arith.constant dense<0.000000e+00> : vector<8x128xf32>
    %212 = tpu.matmul %209, %211, %cst_103 {dimension_numbers = #tpu.dot_dimension_numbers<[1], [0], [0], [1], [0, 0, 1, 1], [], []>} : vector<8x32xf32>, vector<32x128xf32>, vector<8x128xf32> -> vector<8x128xf32>
    %213 = arith.addf %208, %212 : vector<8x128xf32>
    %214 = vector.extract_strided_slice %177 {offsets = [56, 0], sizes = [8, 32], strides = [1, 1]} : vector<128x32xf32> to vector<8x32xf32>
    %c7 = arith.constant 7 : index
    %c0_104 = arith.constant 0 : index
    %c0_105 = arith.constant 0 : index
    %215 = vector.load %arg7[%c7, %c0_104, %c0_105] : memref<16x32x128xf32, #tpu.memory_space<vmem>>, vector<1x32x128xf32>
    %216 = vector.shape_cast %215 : vector<1x32x128xf32> to vector<32x128xf32>
    %cst_106 = arith.constant dense<0.000000e+00> : vector<8x128xf32>
    %217 = tpu.matmul %214, %216, %cst_106 {dimension_numbers = #tpu.dot_dimension_numbers<[1], [0], [0], [1], [0, 0, 1, 1], [], []>} : vector<8x32xf32>, vector<32x128xf32>, vector<8x128xf32> -> vector<8x128xf32>
    %218 = arith.addf %213, %217 : vector<8x128xf32>
    %219 = vector.extract_strided_slice %177 {offsets = [64, 0], sizes = [8, 32], strides = [1, 1]} : vector<128x32xf32> to vector<8x32xf32>
    %c8 = arith.constant 8 : index
    %c0_107 = arith.constant 0 : index
    %c0_108 = arith.constant 0 : index
    %220 = vector.load %arg7[%c8, %c0_107, %c0_108] : memref<16x32x128xf32, #tpu.memory_space<vmem>>, vector<1x32x128xf32>
    %221 = vector.shape_cast %220 : vector<1x32x128xf32> to vector<32x128xf32>
    %cst_109 = arith.constant dense<0.000000e+00> : vector<8x128xf32>
    %222 = tpu.matmul %219, %221, %cst_109 {dimension_numbers = #tpu.dot_dimension_numbers<[1], [0], [0], [1], [0, 0, 1, 1], [], []>} : vector<8x32xf32>, vector<32x128xf32>, vector<8x128xf32> -> vector<8x128xf32>
    %223 = arith.addf %218, %222 : vector<8x128xf32>
    %224 = vector.extract_strided_slice %177 {offsets = [72, 0], sizes = [8, 32], strides = [1, 1]} : vector<128x32xf32> to vector<8x32xf32>
    %c9 = arith.constant 9 : index
    %c0_110 = arith.constant 0 : index
    %c0_111 = arith.constant 0 : index
    %225 = vector.load %arg7[%c9, %c0_110, %c0_111] : memref<16x32x128xf32, #tpu.memory_space<vmem>>, vector<1x32x128xf32>
    %226 = vector.shape_cast %225 : vector<1x32x128xf32> to vector<32x128xf32>
    %cst_112 = arith.constant dense<0.000000e+00> : vector<8x128xf32>
    %227 = tpu.matmul %224, %226, %cst_112 {dimension_numbers = #tpu.dot_dimension_numbers<[1], [0], [0], [1], [0, 0, 1, 1], [], []>} : vector<8x32xf32>, vector<32x128xf32>, vector<8x128xf32> -> vector<8x128xf32>
    %228 = arith.addf %223, %227 : vector<8x128xf32>
    %229 = vector.extract_strided_slice %177 {offsets = [80, 0], sizes = [8, 32], strides = [1, 1]} : vector<128x32xf32> to vector<8x32xf32>
    %c10 = arith.constant 10 : index
    %c0_113 = arith.constant 0 : index
    %c0_114 = arith.constant 0 : index
    %230 = vector.load %arg7[%c10, %c0_113, %c0_114] : memref<16x32x128xf32, #tpu.memory_space<vmem>>, vector<1x32x128xf32>
    %231 = vector.shape_cast %230 : vector<1x32x128xf32> to vector<32x128xf32>
    %cst_115 = arith.constant dense<0.000000e+00> : vector<8x128xf32>
    %232 = tpu.matmul %229, %231, %cst_115 {dimension_numbers = #tpu.dot_dimension_numbers<[1], [0], [0], [1], [0, 0, 1, 1], [], []>} : vector<8x32xf32>, vector<32x128xf32>, vector<8x128xf32> -> vector<8x128xf32>
    %233 = arith.addf %228, %232 : vector<8x128xf32>
    %234 = vector.extract_strided_slice %177 {offsets = [88, 0], sizes = [8, 32], strides = [1, 1]} : vector<128x32xf32> to vector<8x32xf32>
    %c11 = arith.constant 11 : index
    %c0_116 = arith.constant 0 : index
    %c0_117 = arith.constant 0 : index
    %235 = vector.load %arg7[%c11, %c0_116, %c0_117] : memref<16x32x128xf32, #tpu.memory_space<vmem>>, vector<1x32x128xf32>
    %236 = vector.shape_cast %235 : vector<1x32x128xf32> to vector<32x128xf32>
    %cst_118 = arith.constant dense<0.000000e+00> : vector<8x128xf32>
    %237 = tpu.matmul %234, %236, %cst_118 {dimension_numbers = #tpu.dot_dimension_numbers<[1], [0], [0], [1], [0, 0, 1, 1], [], []>} : vector<8x32xf32>, vector<32x128xf32>, vector<8x128xf32> -> vector<8x128xf32>
    %238 = arith.addf %233, %237 : vector<8x128xf32>
    %239 = vector.extract_strided_slice %177 {offsets = [96, 0], sizes = [8, 32], strides = [1, 1]} : vector<128x32xf32> to vector<8x32xf32>
    %c12 = arith.constant 12 : index
    %c0_119 = arith.constant 0 : index
    %c0_120 = arith.constant 0 : index
    %240 = vector.load %arg7[%c12, %c0_119, %c0_120] : memref<16x32x128xf32, #tpu.memory_space<vmem>>, vector<1x32x128xf32>
    %241 = vector.shape_cast %240 : vector<1x32x128xf32> to vector<32x128xf32>
    %cst_121 = arith.constant dense<0.000000e+00> : vector<8x128xf32>
    %242 = tpu.matmul %239, %241, %cst_121 {dimension_numbers = #tpu.dot_dimension_numbers<[1], [0], [0], [1], [0, 0, 1, 1], [], []>} : vector<8x32xf32>, vector<32x128xf32>, vector<8x128xf32> -> vector<8x128xf32>
    %243 = arith.addf %238, %242 : vector<8x128xf32>
    %244 = vector.extract_strided_slice %177 {offsets = [104, 0], sizes = [8, 32], strides = [1, 1]} : vector<128x32xf32> to vector<8x32xf32>
    %c13 = arith.constant 13 : index
    %c0_122 = arith.constant 0 : index
    %c0_123 = arith.constant 0 : index
    %245 = vector.load %arg7[%c13, %c0_122, %c0_123] : memref<16x32x128xf32, #tpu.memory_space<vmem>>, vector<1x32x128xf32>
    %246 = vector.shape_cast %245 : vector<1x32x128xf32> to vector<32x128xf32>
    %cst_124 = arith.constant dense<0.000000e+00> : vector<8x128xf32>
    %247 = tpu.matmul %244, %246, %cst_124 {dimension_numbers = #tpu.dot_dimension_numbers<[1], [0], [0], [1], [0, 0, 1, 1], [], []>} : vector<8x32xf32>, vector<32x128xf32>, vector<8x128xf32> -> vector<8x128xf32>
    %248 = arith.addf %243, %247 : vector<8x128xf32>
    %249 = vector.extract_strided_slice %177 {offsets = [112, 0], sizes = [8, 32], strides = [1, 1]} : vector<128x32xf32> to vector<8x32xf32>
    %c14 = arith.constant 14 : index
    %c0_125 = arith.constant 0 : index
    %c0_126 = arith.constant 0 : index
    %250 = vector.load %arg7[%c14, %c0_125, %c0_126] : memref<16x32x128xf32, #tpu.memory_space<vmem>>, vector<1x32x128xf32>
    %251 = vector.shape_cast %250 : vector<1x32x128xf32> to vector<32x128xf32>
    %cst_127 = arith.constant dense<0.000000e+00> : vector<8x128xf32>
    %252 = tpu.matmul %249, %251, %cst_127 {dimension_numbers = #tpu.dot_dimension_numbers<[1], [0], [0], [1], [0, 0, 1, 1], [], []>} : vector<8x32xf32>, vector<32x128xf32>, vector<8x128xf32> -> vector<8x128xf32>
    %253 = arith.addf %248, %252 : vector<8x128xf32>
    %254 = vector.extract_strided_slice %177 {offsets = [120, 0], sizes = [8, 32], strides = [1, 1]} : vector<128x32xf32> to vector<8x32xf32>
    %c15 = arith.constant 15 : index
    %c0_128 = arith.constant 0 : index
    %c0_129 = arith.constant 0 : index
    %255 = vector.load %arg7[%c15, %c0_128, %c0_129] : memref<16x32x128xf32, #tpu.memory_space<vmem>>, vector<1x32x128xf32>
    %256 = vector.shape_cast %255 : vector<1x32x128xf32> to vector<32x128xf32>
    %cst_130 = arith.constant dense<0.000000e+00> : vector<8x128xf32>
    %257 = tpu.matmul %254, %256, %cst_130 {dimension_numbers = #tpu.dot_dimension_numbers<[1], [0], [0], [1], [0, 0, 1, 1], [], []>} : vector<8x32xf32>, vector<32x128xf32>, vector<8x128xf32> -> vector<8x128xf32>
    %258 = arith.addf %253, %257 : vector<8x128xf32>
    %c0_131 = arith.constant 0 : index
    %c0_132 = arith.constant 0 : index
    %259 = vector.load %arg8[%c0_131, %c0_132] : memref<1x128xf32, #tpu.memory_space<vmem>>, vector<1x128xf32>
    %260 = vector.broadcast %259 : vector<1x128xf32> to vector<8x128xf32>
    %261 = arith.addf %258, %260 : vector<8x128xf32>
    %c0_133 = arith.constant 0 : index
    %c0_134 = arith.constant 0 : index
    %262 = vector.load %arg9[%c0_133, %c0_134] : memref<8x128xf32, #tpu.memory_space<vmem>>, vector<8x128xf32>
    tpu.vector_store %arg9[%c0_133, %c0_134], %261 {strides = array<i32>} : memref<8x128xf32, #tpu.memory_space<vmem>>, vector<8x128xf32>,
    return
  }
}

</mosaic_0001>

<bundles_post_ra>
// kernel: conv_encoder_forward.1
= control target key start
LH: loop header
LB: loop body
LE: loop exit
PB: predicated region body
PF: predicated region fallthrough
CT: control target
= control target key end

     0   :  { %14 = vsyncpa [#allocation3], 0  ;;  %s5203_s30 = smov [#allocation2]   ;;  %s6657_s0 = inlined_call_operand.vmem [shape: f32[128,4], index: 0, kind: input, shape index: {}]   ;;  %s6658_s1 = inlined_call_operand.vmem [shape: f32[3,4,8], index: 1, kind: input, shape index: {}]   ;;  %s6659_s2 = inlined_call_operand.vmem [shape: f32[2,8], index: 2, kind: input, shape index: {}]   ;;  %s6660_s3 = inlined_call_operand.vmem [shape: f32[3,8,16], index: 3, kind: input, shape index: {}]   ;;  %s6661_s4 = inlined_call_operand.vmem [shape: f32[2,16], index: 4, kind: input, shape index: {}]   ;;  %s6662_s5 = inlined_call_operand.vmem [shape: f32[3,16,32], index: 5, kind: input, shape index: {}]   ;;  %s6663_s6 = inlined_call_operand.vmem [shape: f32[2,32], index: 6, kind: input, shape index: {}]   ;;  %s6664_s7 = inlined_call_operand.hbm [shape: f32[16,32,128], index: 7, kind: input, shape index: {}]   ;;  %s6665_s8 = inlined_call_operand.vmem [shape: f32[1,128], index: 8, kind: input, shape index: {}]   ;;  %s6666_s9 = inlined_call_operand.vmem [shape: f32[8,128], index: 9, kind: output, shape index: {}]  }
   0x1   :  { %s34_s10 = sshll.u32 %s5203_s30, 4  ;;  %s5179_s13 = scalar_lea.hbm %s6664_s7, 8192  ;;  %s35_s10 = int_to_ptr.vmem [resolvable:$true] %s34_s10 }
   0x2   :  { %p5180_p0 = scmp.ne.s32.totalorder %s6664_s7, %s5179_s13  ;;  %p5183_p1 = scmp.lt.u32.totalorder %s5179_s13, %s6664_s7 }
   0x4   :  { %p5185_p2 = pnand %p5183_p1, %p5180_p0 }
   0x6   :  { %5188 = shalt.err (!%p5185_p2)
}
   0x7   :  { %s5189_s18 = scalar_lea.vmem %s35_s10, 8192  ;;  %p5194_p4 = scmp.lt.s32.totalorder %s35_s10, %s35_s10 }
   0x8   :  { %p5190_p3 = scmp.ne.s32.totalorder %s35_s10, %s5189_s18  ;;  %p5195_p5 = scmp.lt.s32.totalorder %s5189_s18, %s5189_s18 }
   0xa   :  { %p5196_p6 = por %p5195_p5, %p5194_p4 }
   0xc   :  { %p5197_p7 = pnand %p5196_p6, %p5190_p3 }
   0xe   :  { %5200 = shalt.err (!%p5197_p7)
}
   0xf   :  { %s5204_s19 = smov 128   ;;  %s5205_s20 = smov 8  }
  0x10   :  { %40 = dma.hbm_to_vmem [thread:$0]  %s6664_s7, 8192, %s35_s10, [#allocation3], %s5204_s19, %s5204_s19, %s5205_s20  }
  0x11   :  { %5201 = dma.done.wait [#allocation3], 8192  }
  0x12   :  { %5202 = vsyncadd [#allocation3], 4294959104  ;;  %vm371_vm0 = vcmask 1043456   ;;  %vm322_vm1 = vcmask 31744   ;;  %v3995_v0 = vld [vmem:[%s6658_s1 + $0x4] sm:$0xf]  ;;  %v46_v22 = vlaneseq }
  0x13   :  { %v303_v1 = vld [vmem:[%s6657_s0] sm:$0xff]  ;;  %v304_v2 = vld [vmem:[%s6657_s0 + $0x8] sm:$0xff]  ;;  %4451 = vmatprep.subr.msk.mxu0 %vm371_vm0, %v3995_v0  ;;  %v305_v4 = vld [vmem:[%s6657_s0 + $0x10] sm:$0xff]  ;;  %v5206_v19 = vmov 0.0   ;;  %vm853_vm7 = vcmask 64512  }
  0x14   :  { %4453 = vmatprep.mubr.msk.f32.mxu0 %vm322_vm1, %v303_v1  ;;  %v319_v3 = vld [vmem:[%s6658_s1] sm:$0xf]  ;;  %4452 = vmatpush3.msk.msra.mxu0 %vm371_vm0, %v3995_v0  ;;  %v306_v5 = vld [vmem:[%s6657_s0 + $0x18] sm:$0xff]  ;;  %v4029_v7 = vld [vmem:[%s6658_s1 + $0x8] sm:$0xf]  ;;  %v5391_v23 = vshrl.u32 %v46_v22, 7 }
  0x15   :  { %4454 = vmatmul.mubr.msk.f32.vlgmr.msra.gmra.mrb[0].mxu0 %vm322_vm1, %v304_v2  ;;  %4477 = vmatprep.subr.msk.mxu0 %vm371_vm0, %v319_v3  ;;  %v307_v6 = vld [vmem:[%s6657_s0 + $0x20] sm:$0xff]  ;;  %v308_v8 = vld [vmem:[%s6657_s0 + $0x28] sm:$0xff]  ;;  %v309_v9 = vld [vmem:[%s6657_s0 + $0x30] sm:$0xff] }
  0x16   :  { %4478 = vmatpush3.msk.msra.mxu0 %vm371_vm0, %v319_v3  ;;  %4456 = vmatprep.mubr.msk.f32.mxu0 %vm322_vm1, %v305_v4  ;;  %v310_v10 = vld [vmem:[%s6657_s0 + $0x38] sm:$0xff]  ;;  %v311_v11 = vld [vmem:[%s6657_s0 + $0x40] sm:$0xff]  ;;  %v312_v12 = vld [vmem:[%s6657_s0 + $0x48] sm:$0xff]  ;;  %v48_v24 = vadd.s32 8, %v5391_v23  ;;  %v50_v25 = vadd.s32 24, %v5391_v23  ;;  %v49_v26 = vadd.s32 16, %v5391_v23 }
  0x17   :  { %4503 = vmatprep.subr.msk.mxu0 %vm371_vm0, %v4029_v7  ;;  %v313_v13 = vld [vmem:[%s6657_s0 + $0x50] sm:$0xff]  ;;  %v314_v14 = vld [vmem:[%s6657_s0 + $0x58] sm:$0xff]  ;;  %v315_v15 = vld [vmem:[%s6657_s0 + $0x60] sm:$0xff]  ;;  %v52_v28 = vadd.s32 40, %v5391_v23  ;;  %v67_v29 = vand.u32 7, %v5391_v23  ;;  %v51_v33 = vadd.s32 32, %v5391_v23 }
  0x18   :  { %v316_v16 = vld [vmem:[%s6657_s0 + $0x68] sm:$0xff]  ;;  %v317_v17 = vld [vmem:[%s6657_s0 + $0x70] sm:$0xff]  ;;  %v318_v18 = vld [vmem:[%s6657_s0 + $0x78] sm:$0xff]  ;;  %v74_v27 = vand.u32 7, %v48_v24  ;;  %v88_v30 = vand.u32 7, %v50_v25  ;;  %v81_v31 = vand.u32 7, %v49_v26 }
  0x19   :  { %4457 = vmatmul.mubr.msk.f32.gmra.mrb[2].mxu0 %vm322_vm1, %v306_v5  ;;  %v4064_v20 = vld [vmem:[%s6660_s3 + $0x8] sm:$0xff]  ;;  %v5388_v21 = vld [vmem:[%s6660_s3] sm:$0xff]  ;;  %v102_v32 = vand.u32 7, %v52_v28  ;;  %v54_v34 = vadd.s32 56, %v5391_v23  ;;  %v53_v35 = vadd.s32 48, %v5391_v23  ;;  %vm255_vm3 = vcmp.lt.s32.totalorder %v67_v29, 2 }
  0x1a   :  { %4459 = vmatprep.mubr.msk.f32.mxu0 %vm322_vm1, %v307_v6  ;;  %4529 = vmatprep.subr.mxu1 %v4064_v20  ;;  %vm256_vm2 = vcmp.lt.s32.totalorder %v74_v27, 2  ;;  %v56_v36 = vadd.s32 72, %v5391_v23  ;;  %vm258_vm4 = vcmp.lt.s32.totalorder %v88_v30, 2  ;;  %vm257_vm5 = vcmp.lt.s32.totalorder %v81_v31, 2 }
  0x1b   :  { %4530 = vmatpush3.msra.mxu1 %v4064_v20  ;;  %v5403_v37 = vsel %vm256_vm2, 1.0, %v5206_v19  ;;  %vm260_vm6 = vcmp.lt.s32.totalorder %v102_v32, 2  ;;  %v95_v38 = vand.u32 7, %v51_v33  ;;  %v116_v39 = vand.u32 7, %v54_v34 }
  0x1c   :  { %4555 = vmatprep.subr.mxu1 %v5388_v21  ;;  %v55_v40 = vadd.s32 64, %v5391_v23  ;;  %v5407_v41 = vsel %vm255_vm3, 1.0, %v5206_v19  ;;  %v109_v42 = vand.u32 7, %v53_v35  ;;  %v58_v43 = vadd.s32 88, %v5391_v23 }
  0x1d   :  { %4460 = vmatmul.mubr.msk.f32.gmra.mrb[4].mxu0 %vm322_vm1, %v308_v8  ;;  %v130_v45 = vand.u32 7, %v56_v36  ;;  %v57_v46 = vadd.s32 80, %v5391_v23  ;;  %v5418_v49 = vsel %vm258_vm4, 1.0, %v5206_v19  ;;  %v5421_v50 = vsel %vm257_vm5, 1.0, %v5206_v19 }
  0x1e   :  { %4462 = vmatprep.mubr.msk.f32.mxu0 %vm322_vm1, %v309_v9  ;;  %v5424_v51 = vsel %vm260_vm6, 1.0, %v5206_v19  ;;  %vm5428_vm8 = vcmp.lt.s32.totalorder %v95_v38, 2  ;;  %vm5432_vm9 = vcmp.lt.s32.totalorder %v116_v39, 2  ;;  %v123_v55 = vand.u32 7, %v55_v40 }
  0x1f   :  { %vm5438_vm10 = vcmp.lt.s32.totalorder %v109_v42, 2  ;;  %v144_v59 = vand.u32 7, %v58_v43  ;;  %vm264_vm11 = vcmp.lt.s32.totalorder %v130_v45, 2  ;;  %v137_v63 = vand.u32 7, %v57_v46 }
  0x20   :  { %vm263_vm12 = vcmp.lt.s32.totalorder %v123_v55, 2  ;;  %v60_v22 = vadd.s32 104, %v5391_v23  ;;  %v59_v27 = vadd.s32 96, %v5391_v23  ;;  %v62_v55 = vadd.s32 120, %v5391_v23 }
  0x21   :  { %4463 = vmatmul.mubr.msk.f32.gmra.mrb[6].mxu0 %vm322_vm1, %v310_v10  ;;  %vm5472_vm13 = vcmp.lt.s32.totalorder %v144_v59, 2  ;;  %vm265_vm14 = vcmp.lt.s32.totalorder %v137_v63, 2  ;;  %v5486_v20 = vsel %vm263_vm12, 1.0, %v5206_v19 }
  0x22   :  { %4465 = vmatprep.mubr.msk.f32.mxu0 %vm322_vm1, %v311_v11  ;;  %v5497_v30 = vsel %vm5472_vm13, 1.0, %v5206_v19  ;;  %v5500_v31 = vsel %vm265_vm14, 1.0, %v5206_v19  ;;  %v158_v43 = vand.u32 7, %v60_v22 }
  0x24   :  { %vm5528_vm15 = vcmp.lt.s32.totalorder %v158_v43, 2 }
  0x25   :  { %4466 = vmatmul.mubr.msk.f32.gmra.mrb[8].mxu0 %vm322_vm1, %v312_v12 }
  0x26   :  { %4468 = vmatprep.mubr.msk.f32.mxu0 %vm322_vm1, %v313_v13 }
  0x29   :  { %4469 = vmatmul.mubr.msk.f32.gmra.mrb[10].mxu0 %vm322_vm1, %v314_v14 }
  0x2a   :  { %4471 = vmatprep.mubr.msk.f32.mxu0 %vm322_vm1, %v315_v15 }
  0x2d   :  { %4472 = vmatmul.mubr.msk.f32.gmra.mrb[12].mxu0 %vm322_vm1, %v316_v16 }
  0x2e   :  { %4474 = vmatprep.mubr.msk.f32.mxu0 %vm322_vm1, %v317_v17 }
  0x31   :  { %4475 = vmatmul.mubr.msk.f32.gmra.mrb[14].mxu0 %vm322_vm1, %v318_v18 }
  0x32   :  { %4479 = vmatprep.mubr.f32.mxu0 %v5206_v19 }
  0x35   :  { %4480 = vmatmul.mubr.msk.f32.vlgmr.msra.gmra.mrb[0].mxu0 %vm322_vm1, %v303_v1 }
  0x36   :  { %4504 = vmatpush3.msk.msra.mxu0 %vm371_vm0, %v4029_v7  ;;  %4482 = vmatprep.mubr.msk.f32.mxu0 %vm322_vm1, %v304_v2  ;;  %v5462_v7 = vsel %vm5432_vm9, 1.0, %v5206_v19 }
  0x39   :  { %4483 = vmatmul.mubr.msk.f32.gmra.mrb[2].mxu0 %vm322_vm1, %v305_v4 }
  0x3a   :  { %4485 = vmatprep.mubr.msk.f32.mxu0 %vm322_vm1, %v306_v5 }
  0x3d   :  { %4486 = vmatmul.mubr.msk.f32.gmra.mrb[4].mxu0 %vm322_vm1, %v307_v6 }
  0x3e   :  { %4488 = vmatprep.mubr.msk.f32.mxu0 %vm322_vm1, %v308_v8 }
  0x41   :  { %4489 = vmatmul.mubr.msk.f32.gmra.mrb[6].mxu0 %vm322_vm1, %v309_v9 }
  0x42   :  { %4491 = vmatprep.mubr.msk.f32.mxu0 %vm322_vm1, %v310_v10 }
  0x45   :  { %4492 = vmatmul.mubr.msk.f32.gmra.mrb[8].mxu0 %vm322_vm1, %v311_v11 }
  0x46   :  { %4494 = vmatprep.mubr.msk.f32.mxu0 %vm322_vm1, %v312_v12 }
  0x49   :  { %4495 = vmatmul.mubr.msk.f32.gmra.mrb[10].mxu0 %vm322_vm1, %v313_v13 }
  0x4a   :  { %4497 = vmatprep.mubr.msk.f32.mxu0 %vm322_vm1, %v314_v14 }
  0x4d   :  { %4498 = vmatmul.mubr.msk.f32.gmra.mrb[12].mxu0 %vm322_vm1, %v315_v15 }
  0x4e   :  { %4500 = vmatprep.mubr.msk.f32.mxu0 %vm322_vm1, %v316_v16 }
  0x51   :  { %4501 = vmatmul.mubr.msk.f32.gmra.mrb[14].mxu0 %vm322_vm1, %v317_v17 }
  0x52   :  { %4505 = vmatprep.mubr.msk.f32.mxu0 %vm322_vm1, %v304_v2 }
  0x55   :  { %4506 = vmatmul.mubr.msk.f32.vlgmr.msra.gmra.mrb[0].mxu0 %vm322_vm1, %v305_v4  ;;  %v5454_v4 = vsel %vm5428_vm8, 1.0, %v5206_v19 }
  0x56   :  { %4508 = vmatprep.mubr.msk.f32.mxu0 %vm322_vm1, %v306_v5 }
  0x59   :  { %4509 = vmatmul.mubr.msk.f32.gmra.mrb[2].mxu0 %vm322_vm1, %v307_v6 }
  0x5a   :  { %4511 = vmatprep.mubr.msk.f32.mxu0 %vm322_vm1, %v308_v8 }
  0x5d   :  { %4512 = vmatmul.mubr.msk.f32.gmra.mrb[4].mxu0 %vm322_vm1, %v309_v9  ;;  %v5467_v9 = vsel %vm5438_vm10, 1.0, %v5206_v19 }
  0x5e   :  { %4514 = vmatprep.mubr.msk.f32.mxu0 %vm322_vm1, %v310_v10  ;;  %v5470_v10 = vsel %vm264_vm11, 1.0, %v5206_v19 }
  0x61   :  { %4515 = vmatmul.mubr.msk.f32.gmra.mrb[6].mxu0 %vm322_vm1, %v311_v11 }
  0x62   :  { %4517 = vmatprep.mubr.msk.f32.mxu0 %vm322_vm1, %v312_v12 }
  0x65   :  { %4518 = vmatmul.mubr.msk.f32.gmra.mrb[8].mxu0 %vm322_vm1, %v313_v13 }
  0x66   :  { %4520 = vmatprep.mubr.msk.f32.mxu0 %vm322_vm1, %v314_v14 }
  0x69   :  { %4521 = vmatmul.mubr.msk.f32.gmra.mrb[10].mxu0 %vm322_vm1, %v315_v15 }
  0x6a   :  { %4523 = vmatprep.mubr.msk.f32.mxu0 %vm322_vm1, %v316_v16 }
  0x6d   :  { %4524 = vmatmul.mubr.msk.f32.gmra.mrb[12].mxu0 %vm322_vm1, %v317_v17 }
  0x6e   :  { %4526 = vmatprep.mubr.msk.f32.mxu0 %vm322_vm1, %v318_v18 }
  0x71   :  { %4527 = vmatmul.mubr.f32.gmra.mrb[14].mxu0 %v5206_v19 }
 0x128   :  { %v5410_v44 = vpop.f32.mrb[0].mxu0 }
 0x129   :  { %v838_v47 = vmul.f32 %v5410_v44, %v5403_v37  ;;  %v5415_v48 = vpop.f32.mrb[1].mxu0 }
 0x12a   :  { %v837_v52 = vmul.f32 %v5407_v41, %v5415_v48 }
 0x12b   :  { %v855_v56 = vsel %vm853_vm7, %v838_v47, 0.0  ;;  %v892_v57 = vmul.f32 %v5410_v44, %v838_v47 }
 0x12c   :  { %v854_v60 = vsel %vm853_vm7, %v837_v52, 0.0  ;;  %v891_v61 = vmul.f32 %v837_v52, %v5415_v48  ;;  %v5444_v62 = vpop.f32.mrb[2].mxu0  ;;  %v151_v52 = vand.u32 7, %v59_v27 }
 0x12d   :  { %v908_v0 = vsel %vm853_vm7, %v892_v57, 0.0  ;;  %v856_v1 = vadd.f32 %v855_v56, %v854_v60  ;;  %v840_v2 = vmul.f32 %v5444_v62, %v5418_v49  ;;  %v5449_v3 = vpop.f32.mrb[3].mxu0  ;;  %v61_v56 = vadd.s32 112, %v5391_v23 }
 0x12e   :  { %v907_v5 = vsel %vm853_vm7, %v891_v61, 0.0  ;;  %v839_v6 = vmul.f32 %v5421_v50, %v5449_v3  ;;  %vm5536_vm0 = vcmp.lt.s32.totalorder %v151_v52, 2 }
 0x12f   :  { %v909_v8 = vadd.f32 %v908_v0, %v907_v5  ;;  %v894_v12 = vmul.f32 %v5444_v62, %v840_v2  ;;  %v859_v24 = vsel %vm853_vm7, %v840_v2, 0.0 }
 0x130   :  { %v857_v13 = vsel %vm853_vm7, %v839_v6, 0.0  ;;  %v893_v14 = vmul.f32 %v839_v6, %v5449_v3  ;;  %v5479_v15 = vpop.f32.mrb[4].mxu0 }
 0x131   :  { %v858_v16 = vadd.f32 %v857_v13, %v856_v1  ;;  %v842_v17 = vmul.f32 %v5479_v15, %v5424_v51  ;;  %v5483_v18 = vpop.f32.mrb[5].mxu0  ;;  %v912_v32 = vsel %vm853_vm7, %v894_v12, 0.0 }
 0x132   :  { %v910_v25 = vsel %vm853_vm7, %v893_v14, 0.0  ;;  %v841_v26 = vmul.f32 %v5454_v4, %v5483_v18  ;;  %v172_v14 = vand.u32 7, %v62_v55 }
 0x133   :  { %v911_v28 = vadd.f32 %v910_v25, %v909_v8  ;;  %v860_v29 = vadd.f32 %v859_v24, %v858_v16  ;;  %v896_v33 = vmul.f32 %v5479_v15, %v842_v17  ;;  %v863_v45 = vsel %vm853_vm7, %v842_v17, 0.0 }
 0x134   :  { %v861_v34 = vsel %vm853_vm7, %v841_v26, 0.0  ;;  %v895_v35 = vmul.f32 %v841_v26, %v5483_v18  ;;  %v5506_v36 = vpop.f32.mrb[6].mxu0  ;;  %v165_v16 = vand.u32 7, %v61_v56  ;;  %vm270_vm1 = vcmp.lt.s32.totalorder %v172_v14, 2 }
 0x135   :  { %v862_v38 = vadd.f32 %v861_v34, %v860_v29  ;;  %v913_v39 = vadd.f32 %v912_v32, %v911_v28  ;;  %v844_v40 = vmul.f32 %v5506_v36, %v5462_v7  ;;  %v5510_v42 = vpop.f32.mrb[7].mxu0  ;;  %v916_v57 = vsel %vm853_vm7, %v896_v33, 0.0 }
 0x136   :  { %v914_v46 = vsel %vm853_vm7, %v895_v35, 0.0  ;;  %v843_v47 = vmul.f32 %v5467_v9, %v5510_v42  ;;  %v5553_v33 = vsel %vm5528_vm15, 1.0, %v5206_v19  ;;  %vm5564_vm2 = vcmp.lt.s32.totalorder %v165_v16, 2 }
 0x137   :  { %v915_v53 = vadd.f32 %v914_v46, %v913_v39  ;;  %v864_v54 = vadd.f32 %v863_v45, %v862_v38  ;;  %v898_v58 = vmul.f32 %v5506_v36, %v844_v40  ;;  %v867_v23 = vsel %vm853_vm7, %v844_v40, 0.0 }
 0x138   :  { %v865_v59 = vsel %vm853_vm7, %v843_v47, 0.0  ;;  %v897_v60 = vmul.f32 %v843_v47, %v5510_v42  ;;  %v5522_v61 = vpop.f32.mrb[8].mxu0  ;;  %v5562_v39 = vsel %vm5536_vm0, 1.0, %v5206_v19 }
 0x139   :  { %v866_v63 = vadd.f32 %v865_v59, %v864_v54  ;;  %v917_v0 = vadd.f32 %v916_v57, %v915_v53  ;;  %v846_v1 = vmul.f32 %v5522_v61, %v5470_v10  ;;  %v5526_v2 = vpop.f32.mrb[9].mxu0  ;;  %v920_v17 = vsel %vm853_vm7, %v898_v58, 0.0 }
 0x13a   :  { %v918_v6 = vsel %vm853_vm7, %v897_v60, 0.0  ;;  %v845_v8 = vmul.f32 %v5486_v20, %v5526_v2 }
 0x13b   :  { %v919_v12 = vadd.f32 %v918_v6, %v917_v0  ;;  %v868_v13 = vadd.f32 %v867_v23, %v866_v63  ;;  %v900_v22 = vmul.f32 %v5522_v61, %v846_v1  ;;  %v871_v34 = vsel %vm853_vm7, %v846_v1, 0.0 }
 0x13c   :  { %v869_v24 = vsel %vm853_vm7, %v845_v8, 0.0  ;;  %v899_v25 = vmul.f32 %v845_v8, %v5526_v2  ;;  %v5544_v26 = vpop.f32.mrb[10].mxu0  ;;  %v5583_v0 = vsel %vm270_vm1, 1.0, %v5206_v19  ;;  %v5588_v23 = vsel %vm5564_vm2, 1.0, %v5206_v19 }
 0x13d   :  { %v870_v27 = vadd.f32 %v869_v24, %v868_v13  ;;  %v921_v28 = vadd.f32 %v920_v17, %v919_v12  ;;  %v848_v29 = vmul.f32 %v5544_v26, %v5497_v30  ;;  %v5548_v32 = vpop.f32.mrb[11].mxu0  ;;  %v924_v46 = vsel %vm853_vm7, %v900_v22, 0.0 }
 0x13e   :  { %v922_v35 = vsel %vm853_vm7, %v899_v25, 0.0  ;;  %v847_v38 = vmul.f32 %v5500_v31, %v5548_v32 }
 0x13f   :  { %v923_v40 = vadd.f32 %v922_v35, %v921_v28  ;;  %v872_v43 = vadd.f32 %v871_v34, %v870_v27  ;;  %v902_v47 = vmul.f32 %v5544_v26, %v848_v29  ;;  %v875_v59 = vsel %vm853_vm7, %v848_v29, 0.0 }
 0x140   :  { %v873_v52 = vsel %vm853_vm7, %v847_v38, 0.0  ;;  %v901_v53 = vmul.f32 %v847_v38, %v5548_v32  ;;  %v5572_v54 = vpop.f32.mrb[12].mxu0 }
 0x141   :  { %v874_v55 = vadd.f32 %v873_v52, %v872_v43  ;;  %v925_v56 = vadd.f32 %v924_v46, %v923_v40  ;;  %v850_v57 = vmul.f32 %v5572_v54, %v5553_v33  ;;  %v5576_v58 = vpop.f32.mrb[13].mxu0  ;;  %v928_v6 = vsel %vm853_vm7, %v902_v47, 0.0 }
 0x142   :  { %v926_v60 = vsel %vm853_vm7, %v901_v53, 0.0  ;;  %v849_v63 = vmul.f32 %v5562_v39, %v5576_v58 }
 0x143   :  { %v927_v1 = vadd.f32 %v926_v60, %v925_v56  ;;  %v876_v5 = vadd.f32 %v875_v59, %v874_v55  ;;  %v904_v8 = vmul.f32 %v5572_v54, %v850_v57  ;;  %v879_v24 = vsel %vm853_vm7, %v850_v57, 0.0 }
 0x144   :  { %v877_v11 = vsel %vm853_vm7, %v849_v63, 0.0  ;;  %v903_v12 = vmul.f32 %v849_v63, %v5576_v58  ;;  %v5594_v13 = vpop.f32.mrb[14].mxu0 }
 0x145   :  { %v878_v14 = vadd.f32 %v877_v11, %v876_v5  ;;  %v929_v16 = vadd.f32 %v928_v6, %v927_v1  ;;  %v852_v17 = vmul.f32 %v5594_v13, %v5583_v0  ;;  %v812_v22 = vpop.f32.mrb[15].mxu0  ;;  %v932_v34 = vsel %vm853_vm7, %v904_v8, 0.0 }
 0x146   :  { %v930_v25 = vsel %vm853_vm7, %v903_v12, 0.0  ;;  %v851_v27 = vmul.f32 %v5588_v23, %v812_v22 }
 0x147   :  { %v931_v28 = vadd.f32 %v930_v25, %v929_v16  ;;  %v880_v29 = vadd.f32 %v879_v24, %v878_v14  ;;  %v906_v35 = vmul.f32 %v5594_v13, %v852_v17  ;;  %v883_v46 = vsel %vm853_vm7, %v852_v17, 0.0 }
 0x148   :  { %v881_v38 = vsel %vm853_vm7, %v851_v27, 0.0  ;;  %v905_v40 = vmul.f32 %v851_v27, %v812_v22 }
 0x149   :  { %v882_v43 = vadd.f32 %v881_v38, %v880_v29  ;;  %v933_v45 = vadd.f32 %v932_v34, %v931_v28  ;;  %v936_v55 = vsel %vm853_vm7, %v906_v35, 0.0 }
 0x14a   :  { %v934_v47 = vsel %vm853_vm7, %v905_v40, 0.0 }
 0x14b   :  { %v884_v52 = vadd.f32 %v883_v46, %v882_v43  ;;  %v935_v53 = vadd.f32 %v934_v47, %v933_v45 }
 0x14d   :  { %v885_v56 = vrot.slane %v884_v52, 4  ;;  %v937_v57 = vadd.f32 %v936_v55, %v935_v53 }
 0x14f   :  { %v886_v59 = vadd.f32 %v885_v56, %v884_v52  ;;  %v938_v60 = vrot.slane %v937_v57, 4  ;;  %v5658_v52 = vld [vmem:[%s6659_s2 + $0x1] ss:$0 sm:$0xff] }
 0x151   :  { %v887_v63 = vrot.slane %v886_v59, 2  ;;  %v939_v1 = vadd.f32 %v938_v60, %v937_v57 }
 0x153   :  { %v888_v5 = vadd.f32 %v887_v63, %v886_v59  ;;  %v940_v6 = vrot.slane %v939_v1, 2 }
 0x155   :  { %v889_v8 = vrot.slane %v888_v5, 1  ;;  %v941_v11 = vadd.f32 %v940_v6, %v939_v1 }
 0x157   :  { %v890_v12 = vadd.f32 %v889_v8, %v888_v5  ;;  %v942_v14 = vrot.slane %v941_v11, 1 }
 0x159   :  { %v943_v16 = vadd.f32 %v942_v14, %v941_v11  ;;  %v5607_v17 = vmul.f32 0.03125, %v890_v12 }
 0x15b   :  { %v945_v24 = vmul.f32 0.03125, %v943_v16  ;;  %v946_v25 = vmul.f32 %v5607_v17, %v5607_v17  ;;  %v965_v27 = vsub.f32 %v812_v22, %v5607_v17  ;;  %v951_v28 = vsub.f32 %v5415_v48, %v5607_v17 }
 0x15c   :  { %v952_v29 = vsub.f32 %v5410_v44, %v5607_v17  ;;  %v953_v34 = vsub.f32 %v5449_v3, %v5607_v17  ;;  %v954_v35 = vsub.f32 %v5444_v62, %v5607_v17  ;;  %v955_v38 = vsub.f32 %v5483_v18, %v5607_v17 }
 0x15d   :  { %v947_v40 = vsub.f32 %v945_v24, %v946_v25  ;;  %v956_v43 = vsub.f32 %v5479_v15, %v5607_v17  ;;  %v957_v22 = vsub.f32 %v5510_v42, %v5607_v17  ;;  %v958_v48 = vsub.f32 %v5506_v36, %v5607_v17 }
 0x15e   :  { %v959_v44 = vsub.f32 %v5526_v2, %v5607_v17  ;;  %v960_v3 = vsub.f32 %v5522_v61, %v5607_v17  ;;  %v961_v62 = vsub.f32 %v5548_v32, %v5607_v17  ;;  %v962_v18 = vsub.f32 %v5544_v26, %v5607_v17  ;;  %v5647_v61 = vld [vmem:[%s6659_s2] ss:$0 sm:$0xff] }
 0x15f   :  { %v948_v45 = vmax.f32 %v947_v40, 0.0  ;;  %v963_v15 = vsub.f32 %v5576_v58, %v5607_v17  ;;  %v964_v42 = vsub.f32 %v5572_v54, %v5607_v17  ;;  %v966_v36 = vsub.f32 %v5594_v13, %v5607_v17 }
 0x161   :  { %v967_v2 = vadd.f32 1e-05, %v948_v45 }
 0x163   :  { %5077 = vrsqrt.f32 %v967_v2 }
 0x16d   :  { %v5642_v46 = vpop.eup %5077 }
 0x16e   :  { %v5650_v26 = vmul.f32 %v5642_v46, %v965_v27  ;;  %v969_v32 = vmul.f32 %v5642_v46, %v951_v28  ;;  %v970_v58 = vmul.f32 %v5642_v46, %v952_v29  ;;  %v971_v47 = vmul.f32 %v5642_v46, %v953_v34 }
 0x16f   :  { %v972_v53 = vmul.f32 %v5642_v46, %v954_v35  ;;  %v973_v55 = vmul.f32 %v5642_v46, %v955_v38  ;;  %v974_v56 = vmul.f32 %v5642_v46, %v956_v43  ;;  %v975_v57 = vmul.f32 %v5642_v46, %v957_v22 }
 0x170   :  { %v989_v59 = vmul.f32 %v5647_v61, %v969_v32  ;;  %v990_v60 = vmul.f32 %v5647_v61, %v970_v58  ;;  %v991_v63 = vmul.f32 %v5647_v61, %v971_v47  ;;  %v976_v16 = vmul.f32 %v5642_v46, %v958_v48 }
 0x171   :  { %v992_v1 = vmul.f32 %v5647_v61, %v972_v53  ;;  %v993_v5 = vmul.f32 %v5647_v61, %v973_v55  ;;  %v994_v6 = vmul.f32 %v5647_v61, %v974_v56  ;;  %v995_v8 = vmul.f32 %v5647_v61, %v975_v57 }
 0x172   :  { %v5672_v11 = vadd.f32 %v5658_v52, %v989_v59  ;;  %v5675_v12 = vadd.f32 %v5658_v52, %v990_v60  ;;  %v5678_v14 = vadd.f32 %v5658_v52, %v991_v63  ;;  %v996_v53 = vmul.f32 %v5647_v61, %v976_v16 }
 0x173   :  { %v5682_v24 = vadd.f32 %v5658_v52, %v992_v1  ;;  %v5685_v25 = vadd.f32 %v5658_v52, %v993_v5  ;;  %v5688_v27 = vadd.f32 %v5658_v52, %v994_v6  ;;  %v5693_v34 = vadd.f32 %v5658_v52, %v995_v8 }
 0x174   :  { %v1041_v28 = vmin.f32 %v5672_v11, 0.0  ;;  %v1042_v29 = vmin.f32 %v5675_v12, 0.0  ;;  %v1043_v35 = vmin.f32 %v5678_v14, 0.0  ;;  %v977_v55 = vmul.f32 %v5642_v46, %v959_v44 }
 0x175   :  { %v1044_v38 = vmin.f32 %v5682_v24, 0.0  ;;  %v1045_v22 = vmin.f32 %v5685_v25, 0.0  ;;  %v1046_v2 = vmin.f32 %v5688_v27, 0.0  ;;  %v1047_v58 = vmin.f32 %v5693_v34, 0.0 }
 0x176   :  { %v1057_v40 = vmul.f32 1.442695, %v1041_v28  ;;  %v1059_v43 = vmul.f32 1.442695, %v1042_v29  ;;  %v1061_v48 = vmul.f32 1.442695, %v1043_v35  ;;  %v978_v57 = vmul.f32 %v5642_v46, %v960_v3 }
 0x177   :  { %v1063_v45 = vmul.f32 1.442695, %v1044_v38  ;;  %v1065_v32 = vmul.f32 1.442695, %v1045_v22  ;;  %v1067_v47 = vmul.f32 1.442695, %v1046_v2  ;;  %v979_v59 = vmul.f32 %v5642_v46, %v961_v62 }
 0x178   :  { %5079 = vpow2.f32 %v1057_v40  ;;  %v1069_v56 = vmul.f32 1.442695, %v1047_v58  ;;  %v5705_v60 = vadd.f32 %v5658_v52, %v996_v53  ;;  %v997_v63 = vmul.f32 %v5647_v61, %v977_v55 }
 0x179   :  { %5081 = vpow2.f32 %v1059_v43  ;;  %v980_v1 = vmul.f32 %v5642_v46, %v962_v18  ;;  %v998_v5 = vmul.f32 %v5647_v61, %v978_v57  ;;  %v999_v6 = vmul.f32 %v5647_v61, %v979_v59 }
 0x17a   :  { %5083 = vpow2.f32 %v1061_v48  ;;  %v981_v44 = vmul.f32 %v5642_v46, %v963_v15  ;;  %v1048_v3 = vmin.f32 %v5705_v60, 0.0  ;;  %v5714_v62 = vadd.f32 %v5658_v52, %v997_v63 }
 0x17b   :  { %5085 = vpow2.f32 %v1063_v45  ;;  %v5717_v8 = vadd.f32 %v5658_v52, %v998_v5  ;;  %v5720_v16 = vadd.f32 %v5658_v52, %v999_v6  ;;  %v1000_v18 = vmul.f32 %v5647_v61, %v980_v1 }
 0x17c   :  { %5087 = vpow2.f32 %v1065_v32  ;;  %v1071_v28 = vmul.f32 1.442695, %v1048_v3  ;;  %v1049_v29 = vmin.f32 %v5714_v62, 0.0  ;;  %v1001_v15 = vmul.f32 %v5647_v61, %v981_v44 }
 0x17d   :  { %5089 = vpow2.f32 %v1067_v47  ;;  %v1003_v35 = vmul.f32 %v5647_v61, %v5650_v26  ;;  %vm1025_vm3 = vcmp.gt.f32.partialorder %v5672_v11, 0.0  ;;  %v1050_v38 = vmin.f32 %v5717_v8, 0.0 }
 0x17e   :  { %5091 = vpow2.f32 %v1069_v56  ;;  %v1051_v40 = vmin.f32 %v5720_v16, 0.0  ;;  %v1073_v43 = vmul.f32 1.442695, %v1049_v29  ;;  %v5731_v22 = vadd.f32 %v5658_v52, %v1000_v18 }
 0x17f   :  { %5093 = vpow2.f32 %v1071_v28  ;;  %v5734_v48 = vadd.f32 %v5658_v52, %v1001_v15  ;;  %vm1026_vm4 = vcmp.gt.f32.partialorder %v5675_v12, 0.0  ;;  %v1075_v2 = vmul.f32 1.442695, %v1050_v38 }
 0x180   :  { %v1077_v32 = vmul.f32 1.442695, %v1051_v40  ;;  %v982_v26 = vmul.f32 %v5642_v46, %v964_v42  ;;  %vm1027_vm5 = vcmp.gt.f32.partialorder %v5678_v14, 0.0  ;;  %5095 = vpow2.f32 %v1073_v43 }
 0x181   :  { %v1052_v53 = vmin.f32 %v5731_v22, 0.0  ;;  %5097 = vpow2.f32 %v1075_v2  ;;  %v1053_v57 = vmin.f32 %v5734_v48, 0.0  ;;  %v5745_v59 = vadd.f32 %v5658_v52, %v1003_v35 }
 0x182   :  { %v5080_v45 = vpop.eup %5079  ;;  %5099 = vpow2.f32 %v1077_v32  ;;  %v1002_v18 = vmul.f32 %v5647_v61, %v982_v26  ;;  %vm1028_vm6 = vcmp.gt.f32.partialorder %v5682_v24, 0.0  ;;  %vm1029_vm8 = vcmp.gt.f32.partialorder %v5685_v25, 0.0 }
 0x183   :  { %v5082_v58 = vpop.eup %5081  ;;  %v4048_v47 = vadd.f32 -1.0, %v5080_v45  ;;  %v1079_v1 = vmul.f32 1.442695, %v1052_v53  ;;  %v1081_v3 = vmul.f32 1.442695, %v1053_v57  ;;  %v1055_v38 = vmin.f32 %v5745_v59, 0.0 }
 0x184   :  { %v5084_v55 = vpop.eup %5083  ;;  %v4049_v56 = vadd.f32 -1.0, %v5082_v58  ;;  %v5777_v35 = vadd.f32 %v5658_v52, %v1002_v18  ;;  %vm1030_vm9 = vcmp.gt.f32.partialorder %v5688_v27, 0.0  ;;  %vm1031_vm10 = vcmp.gt.f32.partialorder %v5693_v34, 0.0 }
 0x185   :  { %v5086_v63 = vpop.eup %5085  ;;  %v5750_v54 = vsel %vm1025_vm3, %v5672_v11, %v4048_v47  ;;  %v4050_v42 = vadd.f32 -1.0, %v5084_v55  ;;  %v5763_v11 = vld [vmem:[%s6660_s3 + $0x10] sm:$0xff]  ;;  %5101 = vpow2.f32 %v1079_v1  ;;  %v1085_v13 = vmul.f32 1.442695, %v1055_v38 }
 0x186   :  { %v5088_v5 = vpop.eup %5087  ;;  %4531 = vmatprep.mubr.msk.f32.mxu1 %vm853_vm7, %v5750_v54  ;;  %v5757_v6 = vsel %vm1026_vm4, %v5675_v12, %v4049_v56  ;;  %v4051_v44 = vadd.f32 -1.0, %v5086_v63  ;;  %5103 = vpow2.f32 %v1081_v3  ;;  %v1054_v43 = vmin.f32 %v5777_v35, 0.0 }
 0x187   :  { %v5090_v28 = vpop.eup %5089  ;;  %4532 = vmatmul.mubr.msk.f32.vlgmr.msra.gmra.mrb[0].mxu1 %vm853_vm7, %v5757_v6  ;;  %v5770_v29 = vsel %vm1027_vm5, %v5678_v14, %v4050_v42  ;;  %v4052_v12 = vadd.f32 -1.0, %v5088_v5  ;;  %v984_v14 = vmul.f32 %v5642_v46, %v966_v36  ;;  %5105 = vpow2.f32 %v1085_v13 }
 0x188   :  { %v5092_v15 = vpop.eup %5091  ;;  %4534 = vmatprep.mubr.msk.f32.mxu1 %vm853_vm7, %v5770_v29  ;;  %4556 = vmatpush3.msra.mxu1 %v5388_v21  ;;  %v5787_v40 = vsel %vm1028_vm6, %v5682_v24, %v4051_v44  ;;  %v4053_v21 = vadd.f32 -1.0, %v5090_v28  ;;  %v1083_v36 = vmul.f32 1.442695, %v1054_v43  ;;  %vm1032_vm11 = vcmp.gt.f32.partialorder %v5705_v60, 0.0 }
 0x189   :  { %4581 = vmatprep.subr.mxu1 %v5763_v11  ;;  %v5094_v45 = vpop.eup %5093  ;;  %v5793_v2 = vsel %vm1029_vm8, %v5685_v25, %v4052_v12  ;;  %v4054_v32 = vadd.f32 -1.0, %v5092_v15  ;;  %v1004_v17 = vmul.f32 %v5647_v61, %v984_v14  ;;  %vm1033_vm12 = vcmp.gt.f32.partialorder %v5714_v62, 0.0 }
 0x18a   :  { %v5096_v46 = vpop.eup %5095  ;;  %v5801_v58 = vsel %vm1030_vm9, %v5688_v27, %v4053_v21  ;;  %v4055_v25 = vadd.f32 -1.0, %v5094_v45  ;;  %5107 = vpow2.f32 %v1083_v36  ;;  %vm1034_vm13 = vcmp.gt.f32.partialorder %v5717_v8, 0.0 }
 0x18b   :  { %4535 = vmatmul.mubr.msk.f32.gmra.mrb[2].mxu1 %vm853_vm7, %v5787_v40  ;;  %v1024_v24 = vadd.f32 %v5658_v52, %v1004_v17  ;;  %v5098_v26 = vpop.eup %5097  ;;  %v5807_v61 = vsel %vm1031_vm10, %v5693_v34, %v4054_v32  ;;  %v4056_v53 = vadd.f32 -1.0, %v5096_v46  ;;  %vm1035_vm14 = vcmp.gt.f32.partialorder %v5720_v16, 0.0 }
 0x18c   :  { %4537 = vmatprep.mubr.msk.f32.mxu1 %vm853_vm7, %v5793_v2  ;;  %v5100_v47 = vpop.eup %5099  ;;  %v1112_v27 = vsel %vm1032_vm11, %v5705_v60, %v4055_v25  ;;  %v4057_v56 = vadd.f32 -1.0, %v5098_v26  ;;  %vm1036_vm15 = vcmp.gt.f32.partialorder %v5731_v22, 0.0  ;;  %vm1037_vm0 = vcmp.gt.f32.partialorder %v5734_v48, 0.0 }
 0x18d   :  { %v1056_v55 = vmin.f32 %v1024_v24, 0.0  ;;  %v1113_v63 = vsel %vm1033_vm12, %v5714_v62, %v4056_v53  ;;  %v4058_v34 = vadd.f32 -1.0, %v5100_v47  ;;  %vm1038_vm1 = vcmp.gt.f32.partialorder %v5777_v35, 0.0 }
 0x18e   :  { %v1114_v1 = vsel %vm1034_vm13, %v5717_v8, %v4057_v56  ;;  %vm1039_vm2 = vcmp.gt.f32.partialorder %v5745_v59, 0.0  ;;  %vm1040_vm3 = vcmp.gt.f32.partialorder %v1024_v24, 0.0 }
 0x18f   :  { %4538 = vmatmul.mubr.msk.f32.gmra.mrb[4].mxu1 %vm853_vm7, %v5801_v58  ;;  %v1087_v52 = vmul.f32 1.442695, %v1056_v55  ;;  %v5102_v57 = vpop.eup %5101  ;;  %v1115_v44 = vsel %vm1035_vm14, %v5720_v16, %v4058_v34 }
 0x190   :  { %4540 = vmatprep.mubr.msk.f32.mxu1 %vm853_vm7, %v5807_v61  ;;  %v5104_v42 = vpop.eup %5103  ;;  %v4059_v60 = vadd.f32 -1.0, %v5102_v57 }
 0x191   :  { %5109 = vpow2.f32 %v1087_v52  ;;  %v5106_v5 = vpop.eup %5105  ;;  %v4060_v3 = vadd.f32 -1.0, %v5104_v42 }
 0x192   :  { %v1116_v62 = vsel %vm1036_vm15, %v5731_v22, %v4059_v60  ;;  %v4062_v12 = vadd.f32 -1.0, %v5106_v5 }
 0x193   :  { %4541 = vmatmul.mubr.msk.f32.gmra.mrb[6].mxu1 %vm853_vm7, %v1112_v27  ;;  %v1117_v8 = vsel %vm1037_vm0, %v5734_v48, %v4060_v3  ;;  %v4130_v48 = vld [vmem:[%s6662_s5 + $0x10] sm:$0xff] }
 0x194   :  { %4543 = vmatprep.mubr.msk.f32.mxu1 %vm853_vm7, %v1113_v63  ;;  %v5108_v18 = vpop.eup %5107  ;;  %v1119_v22 = vsel %vm1039_vm2, %v5745_v59, %v4062_v12  ;;  %v4131_v59 = vld [vmem:[%s6662_s5 + $0x18] sm:$0xff] }
 0x195   :  { %v4061_v28 = vadd.f32 -1.0, %v5108_v18 }
 0x197   :  { %4544 = vmatmul.mubr.msk.f32.gmra.mrb[8].mxu1 %vm853_vm7, %v1114_v1  ;;  %v1118_v16 = vsel %vm1038_vm1, %v5777_v35, %v4061_v28 }
 0x198   :  { %4546 = vmatprep.mubr.msk.f32.mxu1 %vm853_vm7, %v1115_v44 }
 0x19b   :  { %4547 = vmatmul.mubr.msk.f32.gmra.mrb[10].mxu1 %vm853_vm7, %v1116_v62  ;;  %v5110_v15 = vpop.eup %5109 }
 0x19c   :  { %4549 = vmatprep.mubr.msk.f32.mxu1 %vm853_vm7, %v1117_v8  ;;  %v4063_v38 = vadd.f32 -1.0, %v5110_v15 }
 0x19e   :  { %v1120_v14 = vsel %vm1040_vm3, %v1024_v24, %v4063_v38 }
 0x19f   :  { %4550 = vmatmul.mubr.msk.f32.gmra.mrb[12].mxu1 %vm853_vm7, %v1118_v16 }
 0x1a0   :  { %4552 = vmatprep.mubr.msk.f32.mxu1 %vm853_vm7, %v1119_v22 }
 0x1a3   :  { %4553 = vmatmul.mubr.msk.f32.gmra.mrb[14].mxu1 %vm853_vm7, %v1120_v14 }
 0x1a4   :  { %4557 = vmatprep.mubr.f32.mxu1 %v5206_v19 }
 0x1a7   :  { %4558 = vmatmul.mubr.msk.f32.vlgmr.msra.gmra.mrb[0].mxu1 %vm853_vm7, %v5750_v54  ;;  %v4867_v54 = vpack.c.bf16 %v4131_v59, %v4130_v48 }
 0x1a8   :  { %4560 = vmatprep.mubr.msk.f32.mxu1 %vm853_vm7, %v5757_v6  ;;  %4582 = vmatpush3.msra.mxu1 %v5763_v11  ;;  %v1912_v11 = vld [vmem:[%s6662_s5 + $0x8] sm:$0xff] }
 0x1a9   :  { %4868 = vmatprep.subr.bf16.mxu0 %v4867_v54 }
 0x1aa   :  { %4870 = vmatpush3.bf16.msra.mxu0 %v4867_v54 }
 0x1ab   :  { %4561 = vmatmul.mubr.msk.f32.gmra.mrb[2].mxu1 %vm853_vm7, %v5770_v29 }
 0x1ac   :  { %4563 = vmatprep.mubr.msk.f32.mxu1 %vm853_vm7, %v5787_v40 }
 0x1af   :  { %4564 = vmatmul.mubr.msk.f32.gmra.mrb[4].mxu1 %vm853_vm7, %v5793_v2 }
 0x1b0   :  { %4566 = vmatprep.mubr.msk.f32.mxu1 %vm853_vm7, %v5801_v58 }
 0x1b3   :  { %4567 = vmatmul.mubr.msk.f32.gmra.mrb[6].mxu1 %vm853_vm7, %v5807_v61 }
 0x1b4   :  { %4569 = vmatprep.mubr.msk.f32.mxu1 %vm853_vm7, %v1112_v27 }
 0x1b7   :  { %4570 = vmatmul.mubr.msk.f32.gmra.mrb[8].mxu1 %vm853_vm7, %v1113_v63 }
 0x1b8   :  { %4572 = vmatprep.mubr.msk.f32.mxu1 %vm853_vm7, %v1114_v1 }
 0x1bb   :  { %4573 = vmatmul.mubr.msk.f32.gmra.mrb[10].mxu1 %vm853_vm7, %v1115_v44 }
 0x1bc   :  { %4575 = vmatprep.mubr.msk.f32.mxu1 %vm853_vm7, %v1116_v62 }
 0x1bf   :  { %4576 = vmatmul.mubr.msk.f32.gmra.mrb[12].mxu1 %vm853_vm7, %v1117_v8 }
 0x1c0   :  { %4578 = vmatprep.mubr.msk.f32.mxu1 %vm853_vm7, %v1118_v16 }
 0x1c3   :  { %4579 = vmatmul.mubr.msk.f32.gmra.mrb[14].mxu1 %vm853_vm7, %v1119_v22 }
 0x1c4   :  { %4583 = vmatprep.mubr.msk.f32.mxu1 %vm853_vm7, %v5757_v6  ;;  %v1911_v6 = vld [vmem:[%s6662_s5] sm:$0xff] }
 0x1c7   :  { %4584 = vmatmul.mubr.msk.f32.vlgmr.msra.gmra.mrb[0].mxu1 %vm853_vm7, %v5770_v29  ;;  %v5894_v29 = vpack.c.bf16 %v1912_v11, %v1911_v6 }
 0x1c8   :  { %4586 = vmatprep.mubr.msk.f32.mxu1 %vm853_vm7, %v5787_v40 }
 0x1c9   :  { %4872 = vmatprep.subr.bf16.mxu0 %v5894_v29 }
 0x1cb   :  { %4587 = vmatmul.mubr.msk.f32.gmra.mrb[2].mxu1 %vm853_vm7, %v5793_v2 }
 0x1cc   :  { %4589 = vmatprep.mubr.msk.f32.mxu1 %vm853_vm7, %v5801_v58 }
 0x1cf   :  { %4590 = vmatmul.mubr.msk.f32.gmra.mrb[4].mxu1 %vm853_vm7, %v5807_v61 }
 0x1d0   :  { %4592 = vmatprep.mubr.msk.f32.mxu1 %vm853_vm7, %v1112_v27 }
 0x1d3   :  { %4593 = vmatmul.mubr.msk.f32.gmra.mrb[6].mxu1 %vm853_vm7, %v1113_v63 }
 0x1d4   :  { %4595 = vmatprep.mubr.msk.f32.mxu1 %vm853_vm7, %v1114_v1 }
 0x1d7   :  { %4596 = vmatmul.mubr.msk.f32.gmra.mrb[8].mxu1 %vm853_vm7, %v1115_v44 }
 0x1d8   :  { %4598 = vmatprep.mubr.msk.f32.mxu1 %vm853_vm7, %v1116_v62 }
 0x1db   :  { %4599 = vmatmul.mubr.msk.f32.gmra.mrb[10].mxu1 %vm853_vm7, %v1117_v8 }
 0x1dc   :  { %4601 = vmatprep.mubr.msk.f32.mxu1 %vm853_vm7, %v1118_v16 }
 0x1df   :  { %4602 = vmatmul.mubr.msk.f32.gmra.mrb[12].mxu1 %vm853_vm7, %v1119_v22 }
 0x1e0   :  { %4604 = vmatprep.mubr.msk.f32.mxu1 %vm853_vm7, %v1120_v14  ;;  %vm1643_vm7 = vcmask 130048  }
 0x1e3   :  { %4605 = vmatmul.mubr.f32.gmra.mrb[14].mxu1 %v5206_v19 }
 0x29a   :  { %v5897_v35 = vpop.f32.mrb[0].mxu1 }
 0x29b   :  { %v1628_v40 = vmul.f32 %v5897_v35, %v5403_v37  ;;  %v5901_v21 = vpop.f32.mrb[1].mxu1 }
 0x29c   :  { %v1627_v43 = vmul.f32 %v5407_v41, %v5901_v21 }
 0x29d   :  { %v1645_v45 = vsel %vm1643_vm7, %v1628_v40, 0.0  ;;  %v1682_v2 = vmul.f32 %v5897_v35, %v1628_v40 }
 0x29e   :  { %v1644_v32 = vsel %vm1643_vm7, %v1627_v43, 0.0  ;;  %v1681_v13 = vmul.f32 %v1627_v43, %v5901_v21  ;;  %v5909_v17 = vpop.f32.mrb[2].mxu1 }
 0x29f   :  { %v1698_v36 = vsel %vm1643_vm7, %v1682_v2, 0.0  ;;  %v1646_v46 = vadd.f32 %v1645_v45, %v1644_v32  ;;  %v1630_v24 = vmul.f32 %v5909_v17, %v5418_v49  ;;  %v5914_v26 = vpop.f32.mrb[3].mxu1 }
 0x2a0   :  { %v1697_v58 = vsel %vm1643_vm7, %v1681_v13, 0.0  ;;  %v1629_v25 = vmul.f32 %v5421_v50, %v5914_v26 }
 0x2a1   :  { %v1699_v47 = vadd.f32 %v1698_v36, %v1697_v58  ;;  %v1684_v61 = vmul.f32 %v5909_v17, %v1630_v24  ;;  %v1649_v63 = vsel %vm1643_vm7, %v1630_v24, 0.0 }
 0x2a2   :  { %v1647_v53 = vsel %vm1643_vm7, %v1629_v25, 0.0  ;;  %v1683_v55 = vmul.f32 %v1629_v25, %v5914_v26  ;;  %v5922_v52 = vpop.f32.mrb[4].mxu1 }
 0x2a3   :  { %v1648_v27 = vadd.f32 %v1647_v53, %v1646_v46  ;;  %v1632_v56 = vmul.f32 %v5922_v52, %v5424_v51  ;;  %v5926_v57 = vpop.f32.mrb[5].mxu1  ;;  %v1702_v5 = vsel %vm1643_vm7, %v1684_v61, 0.0 }
 0x2a4   :  { %v1700_v34 = vsel %vm1643_vm7, %v1683_v55, 0.0  ;;  %v1631_v42 = vmul.f32 %v5454_v4, %v5926_v57 }
 0x2a5   :  { %v1701_v1 = vadd.f32 %v1700_v34, %v1699_v47  ;;  %v1650_v60 = vadd.f32 %v1649_v63, %v1648_v27  ;;  %v1686_v44 = vmul.f32 %v5922_v52, %v1632_v56  ;;  %v1653_v16 = vsel %vm1643_vm7, %v1632_v56, 0.0 }
 0x2a6   :  { %v1651_v3 = vsel %vm1643_vm7, %v1631_v42, 0.0  ;;  %v1685_v18 = vmul.f32 %v1631_v42, %v5926_v57  ;;  %v5936_v62 = vpop.f32.mrb[6].mxu1 }
 0x2a7   :  { %v1652_v28 = vadd.f32 %v1651_v3, %v1650_v60  ;;  %v1703_v8 = vadd.f32 %v1702_v5, %v1701_v1  ;;  %v1634_v12 = vmul.f32 %v5936_v62, %v5462_v7  ;;  %v5940_v15 = vpop.f32.mrb[7].mxu1  ;;  %v1706_v59 = vsel %vm1643_vm7, %v1686_v44, 0.0 }
 0x2a8   :  { %v1704_v38 = vsel %vm1643_vm7, %v1685_v18, 0.0  ;;  %v1633_v22 = vmul.f32 %v5467_v9, %v5940_v15 }
 0x2a9   :  { %v1705_v14 = vadd.f32 %v1704_v38, %v1703_v8  ;;  %v1654_v48 = vadd.f32 %v1653_v16, %v1652_v28  ;;  %v1688_v54 = vmul.f32 %v5936_v62, %v1634_v12  ;;  %v1657_v13 = vsel %vm1643_vm7, %v1634_v12, 0.0 }
 0x2aa   :  { %v1655_v6 = vsel %vm1643_vm7, %v1633_v22, 0.0  ;;  %v1687_v11 = vmul.f32 %v1633_v22, %v5940_v15  ;;  %v5950_v40 = vpop.f32.mrb[8].mxu1 }
 0x2ab   :  { %v1656_v43 = vadd.f32 %v1655_v6, %v1654_v48  ;;  %v1707_v45 = vadd.f32 %v1706_v59, %v1705_v14  ;;  %v1636_v2 = vmul.f32 %v5950_v40, %v5470_v10  ;;  %v5954_v32 = vpop.f32.mrb[9].mxu1  ;;  %v1710_v25 = vsel %vm1643_vm7, %v1688_v54, 0.0 }
 0x2ac   :  { %v1708_v36 = vsel %vm1643_vm7, %v1687_v11, 0.0  ;;  %v1635_v46 = vmul.f32 %v5486_v20, %v5954_v32 }
 0x2ad   :  { %v1709_v24 = vadd.f32 %v1708_v36, %v1707_v45  ;;  %v1658_v58 = vadd.f32 %v1657_v13, %v1656_v43  ;;  %v1690_v47 = vmul.f32 %v5950_v40, %v1636_v2  ;;  %v1661_v42 = vsel %vm1643_vm7, %v1636_v2, 0.0 }
 0x2ae   :  { %v1659_v61 = vsel %vm1643_vm7, %v1635_v46, 0.0  ;;  %v1689_v53 = vmul.f32 %v1635_v46, %v5954_v32  ;;  %v5964_v55 = vpop.f32.mrb[10].mxu1 }
 0x2af   :  { %v1660_v27 = vadd.f32 %v1659_v61, %v1658_v58  ;;  %v1711_v56 = vadd.f32 %v1710_v25, %v1709_v24  ;;  %v1638_v63 = vmul.f32 %v5964_v55, %v5497_v30  ;;  %v5968_v34 = vpop.f32.mrb[11].mxu1  ;;  %v1714_v3 = vsel %vm1643_vm7, %v1690_v47, 0.0 }
 0x2b0   :  { %v1712_v1 = vsel %vm1643_vm7, %v1689_v53, 0.0  ;;  %v1637_v60 = vmul.f32 %v5500_v31, %v5968_v34 }
 0x2b1   :  { %v1713_v5 = vadd.f32 %v1712_v1, %v1711_v56  ;;  %v1662_v44 = vadd.f32 %v1661_v42, %v1660_v27  ;;  %v1692_v18 = vmul.f32 %v5964_v55, %v1638_v63  ;;  %v1665_v48 = vsel %vm1643_vm7, %v1638_v63, 0.0 }
 0x2b2   :  { %v1663_v28 = vsel %vm1643_vm7, %v1637_v60, 0.0  ;;  %v1691_v8 = vmul.f32 %v1637_v60, %v5968_v34  ;;  %v5978_v12 = vpop.f32.mrb[12].mxu1 }
 0x2b3   :  { %v1664_v16 = vadd.f32 %v1663_v28, %v1662_v44  ;;  %v1715_v38 = vadd.f32 %v1714_v3, %v1713_v5  ;;  %v1640_v22 = vmul.f32 %v5978_v12, %v5553_v33  ;;  %v5982_v14 = vpop.f32.mrb[13].mxu1  ;;  %v1718_v43 = vsel %vm1643_vm7, %v1692_v18, 0.0 }
 0x2b4   :  { %v1716_v59 = vsel %vm1643_vm7, %v1691_v8, 0.0  ;;  %v1639_v54 = vmul.f32 %v5562_v39, %v5982_v14 }
 0x2b5   :  { %v1717_v6 = vadd.f32 %v1716_v59, %v1715_v38  ;;  %v1666_v11 = vadd.f32 %v1665_v48, %v1664_v16  ;;  %v1694_v45 = vmul.f32 %v5978_v12, %v1640_v22  ;;  %v1669_v47 = vsel %vm1643_vm7, %v1640_v22, 0.0 }
 0x2b6   :  { %v1667_v2 = vsel %vm1643_vm7, %v1639_v54, 0.0  ;;  %v1693_v13 = vmul.f32 %v1639_v54, %v5982_v14  ;;  %v5992_v36 = vpop.f32.mrb[14].mxu1 }
 0x2b7   :  { %v1668_v46 = vadd.f32 %v1667_v2, %v1666_v11  ;;  %v1719_v24 = vadd.f32 %v1718_v43, %v1717_v6  ;;  %v1642_v58 = vmul.f32 %v5992_v36, %v5583_v0  ;;  %v1602_v25 = vpop.f32.mrb[15].mxu1  ;;  %v1722_v63 = vsel %vm1643_vm7, %v1694_v45, 0.0 }
 0x2b8   :  { %v1720_v61 = vsel %vm1643_vm7, %v1693_v13, 0.0  ;;  %v1641_v53 = vmul.f32 %v5588_v23, %v1602_v25 }
 0x2b9   :  { %v1721_v27 = vadd.f32 %v1720_v61, %v1719_v24  ;;  %v1670_v56 = vadd.f32 %v1669_v47, %v1668_v46  ;;  %v1696_v42 = vmul.f32 %v5992_v36, %v1642_v58  ;;  %v1673_v3 = vsel %vm1643_vm7, %v1642_v58, 0.0 }
 0x2ba   :  { %v1671_v1 = vsel %vm1643_vm7, %v1641_v53, 0.0  ;;  %v1695_v60 = vmul.f32 %v1641_v53, %v1602_v25 }
 0x2bb   :  { %v1672_v5 = vadd.f32 %v1671_v1, %v1670_v56  ;;  %v1723_v44 = vadd.f32 %v1722_v63, %v1721_v27  ;;  %v1726_v16 = vsel %vm1643_vm7, %v1696_v42, 0.0 }
 0x2bc   :  { %v1724_v18 = vsel %vm1643_vm7, %v1695_v60, 0.0 }
 0x2bd   :  { %v1674_v28 = vadd.f32 %v1673_v3, %v1672_v5  ;;  %v1725_v8 = vadd.f32 %v1724_v18, %v1723_v44 }
 0x2bf   :  { %v1675_v38 = vrot.slane %v1674_v28, 4  ;;  %v1727_v22 = vadd.f32 %v1726_v16, %v1725_v8 }
 0x2c1   :  { %v1676_v48 = vadd.f32 %v1675_v38, %v1674_v28  ;;  %v1728_v59 = vrot.slane %v1727_v22, 4  ;;  %v6056_v28 = vld [vmem:[%s6661_s4 + $0x1] ss:$0 sm:$0xff] }
 0x2c3   :  { %v1677_v54 = vrot.slane %v1676_v48, 2  ;;  %v1729_v6 = vadd.f32 %v1728_v59, %v1727_v22 }
 0x2c5   :  { %v1678_v11 = vadd.f32 %v1677_v54, %v1676_v48  ;;  %v1730_v43 = vrot.slane %v1729_v6, 2 }
 0x2c7   :  { %v1679_v45 = vrot.slane %v1678_v11, 1  ;;  %v1731_v2 = vadd.f32 %v1730_v43, %v1729_v6 }
 0x2c9   :  { %v1680_v13 = vadd.f32 %v1679_v45, %v1678_v11  ;;  %v1732_v46 = vrot.slane %v1731_v2, 1 }
 0x2cb   :  { %v1733_v24 = vadd.f32 %v1732_v46, %v1731_v2  ;;  %v6005_v58 = vmul.f32 0.03125, %v1680_v13 }
 0x2cd   :  { %v1735_v47 = vmul.f32 0.03125, %v1733_v24  ;;  %v1736_v61 = vmul.f32 %v6005_v58, %v6005_v58  ;;  %v1755_v53 = vsub.f32 %v1602_v25, %v6005_v58  ;;  %v1741_v27 = vsub.f32 %v5901_v21, %v6005_v58 }
 0x2ce   :  { %v1742_v56 = vsub.f32 %v5897_v35, %v6005_v58  ;;  %v1743_v63 = vsub.f32 %v5914_v26, %v6005_v58  ;;  %v1744_v42 = vsub.f32 %v5909_v17, %v6005_v58  ;;  %v1745_v1 = vsub.f32 %v5926_v57, %v6005_v58 }
 0x2cf   :  { %v1737_v60 = vsub.f32 %v1735_v47, %v1736_v61  ;;  %v1746_v5 = vsub.f32 %v5922_v52, %v6005_v58  ;;  %v1747_v25 = vsub.f32 %v5940_v15, %v6005_v58  ;;  %v1748_v21 = vsub.f32 %v5936_v62, %v6005_v58 }
 0x2d0   :  { %v1749_v35 = vsub.f32 %v5954_v32, %v6005_v58  ;;  %v1750_v26 = vsub.f32 %v5950_v40, %v6005_v58  ;;  %v1751_v17 = vsub.f32 %v5968_v34, %v6005_v58  ;;  %v1752_v57 = vsub.f32 %v5964_v55, %v6005_v58  ;;  %v6045_v40 = vld [vmem:[%s6661_s4] ss:$0 sm:$0xff] }
 0x2d1   :  { %v1738_v44 = vmax.f32 %v1737_v60, 0.0  ;;  %v1753_v52 = vsub.f32 %v5982_v14, %v6005_v58  ;;  %v1754_v15 = vsub.f32 %v5978_v12, %v6005_v58  ;;  %v1756_v62 = vsub.f32 %v5992_v36, %v6005_v58 }
 0x2d3   :  { %v1757_v32 = vadd.f32 1e-05, %v1738_v44 }
 0x2d5   :  { %5111 = vrsqrt.f32 %v1757_v32 }
 0x2df   :  { %v6040_v3 = vpop.eup %5111 }
 0x2e0   :  { %v6048_v55 = vmul.f32 %v6040_v3, %v1755_v53  ;;  %v1759_v34 = vmul.f32 %v6040_v3, %v1741_v27  ;;  %v1760_v14 = vmul.f32 %v6040_v3, %v1742_v56  ;;  %v1761_v18 = vmul.f32 %v6040_v3, %v1743_v63 }
 0x2e1   :  { %v1762_v8 = vmul.f32 %v6040_v3, %v1744_v42  ;;  %v1763_v16 = vmul.f32 %v6040_v3, %v1745_v1  ;;  %v1764_v38 = vmul.f32 %v6040_v3, %v1746_v5  ;;  %v1765_v22 = vmul.f32 %v6040_v3, %v1747_v25 }
 0x2e2   :  { %v1779_v48 = vmul.f32 %v6045_v40, %v1759_v34  ;;  %v1780_v59 = vmul.f32 %v6045_v40, %v1760_v14  ;;  %v1781_v54 = vmul.f32 %v6045_v40, %v1761_v18  ;;  %v1766_v24 = vmul.f32 %v6040_v3, %v1748_v21 }
 0x2e3   :  { %v1782_v6 = vmul.f32 %v6045_v40, %v1762_v8  ;;  %v1783_v11 = vmul.f32 %v6045_v40, %v1763_v16  ;;  %v1784_v43 = vmul.f32 %v6045_v40, %v1764_v38  ;;  %v1785_v45 = vmul.f32 %v6045_v40, %v1765_v22 }
 0x2e4   :  { %v6070_v2 = vadd.f32 %v6056_v28, %v1779_v48  ;;  %v6073_v13 = vadd.f32 %v6056_v28, %v1780_v59  ;;  %v6076_v46 = vadd.f32 %v6056_v28, %v1781_v54  ;;  %v1786_v8 = vmul.f32 %v6045_v40, %v1766_v24 }
 0x2e5   :  { %v6080_v47 = vadd.f32 %v6056_v28, %v1782_v6  ;;  %v6083_v61 = vadd.f32 %v6056_v28, %v1783_v11  ;;  %v6086_v53 = vadd.f32 %v6056_v28, %v1784_v43  ;;  %v6091_v63 = vadd.f32 %v6056_v28, %v1785_v45 }
 0x2e6   :  { %v1831_v27 = vmin.f32 %v6070_v2, 0.0  ;;  %v1832_v56 = vmin.f32 %v6073_v13, 0.0  ;;  %v1833_v42 = vmin.f32 %v6076_v46, 0.0  ;;  %v1767_v16 = vmul.f32 %v6040_v3, %v1749_v35 }
 0x2e7   :  { %v1834_v1 = vmin.f32 %v6080_v47, 0.0  ;;  %v1835_v25 = vmin.f32 %v6083_v61, 0.0  ;;  %v1836_v32 = vmin.f32 %v6086_v53, 0.0  ;;  %v1837_v14 = vmin.f32 %v6091_v63, 0.0 }
 0x2e8   :  { %v1847_v60 = vmul.f32 1.442695, %v1831_v27  ;;  %v1849_v5 = vmul.f32 1.442695, %v1832_v56  ;;  %v1851_v21 = vmul.f32 1.442695, %v1833_v42  ;;  %v1768_v22 = vmul.f32 %v6040_v3, %v1750_v26 }
 0x2e9   :  { %v1853_v44 = vmul.f32 1.442695, %v1834_v1  ;;  %v1855_v34 = vmul.f32 1.442695, %v1835_v25  ;;  %v1857_v18 = vmul.f32 1.442695, %v1836_v32  ;;  %v1769_v48 = vmul.f32 %v6040_v3, %v1751_v17 }
 0x2ea   :  { %5113 = vpow2.f32 %v1847_v60  ;;  %v1859_v38 = vmul.f32 1.442695, %v1837_v14  ;;  %v6103_v59 = vadd.f32 %v6056_v28, %v1786_v8  ;;  %v1787_v54 = vmul.f32 %v6045_v40, %v1767_v16  ;;  %v4163_v26 = vld [vmem:[%s6662_s5 + $0x20] sm:$0xff]  ;;  %v4164_v17 = vld [vmem:[%s6662_s5 + $0x28] sm:$0xff] }
 0x2eb   :  { %5115 = vpow2.f32 %v1849_v5  ;;  %v1770_v6 = vmul.f32 %v6040_v3, %v1752_v57  ;;  %v1788_v11 = vmul.f32 %v6045_v40, %v1768_v22  ;;  %v1789_v43 = vmul.f32 %v6045_v40, %v1769_v48 }
 0x2ec   :  { %5117 = vpow2.f32 %v1851_v21  ;;  %v1771_v35 = vmul.f32 %v6040_v3, %v1753_v52  ;;  %v1838_v45 = vmin.f32 %v6103_v59, 0.0  ;;  %v6118_v57 = vadd.f32 %v6056_v28, %v1787_v54 }
 0x2ed   :  { %5119 = vpow2.f32 %v1853_v44  ;;  %v6121_v24 = vadd.f32 %v6056_v28, %v1788_v11  ;;  %v6124_v52 = vadd.f32 %v6056_v28, %v1789_v43  ;;  %v1790_v27 = vmul.f32 %v6045_v40, %v1770_v6 }
 0x2ee   :  { %5121 = vpow2.f32 %v1855_v34  ;;  %v1861_v56 = vmul.f32 1.442695, %v1838_v45  ;;  %v1839_v42 = vmin.f32 %v6118_v57, 0.0  ;;  %v1791_v1 = vmul.f32 %v6045_v40, %v1771_v35 }
 0x2ef   :  { %5123 = vpow2.f32 %v1857_v18  ;;  %v6129_v60 = vpack.c.bf16 %v4164_v17, %v4163_v26  ;;  %v1793_v5 = vmul.f32 %v6045_v40, %v6048_v55  ;;  %vm1815_vm4 = vcmp.gt.f32.partialorder %v6070_v2, 0.0 }
 0x2f0   :  { %5125 = vpow2.f32 %v1859_v38  ;;  %v1840_v25 = vmin.f32 %v6121_v24, 0.0  ;;  %v1841_v21 = vmin.f32 %v6124_v52, 0.0  ;;  %v1863_v44 = vmul.f32 1.442695, %v1839_v42 }
 0x2f1   :  { %5127 = vpow2.f32 %v1861_v56  ;;  %v6137_v32 = vadd.f32 %v6056_v28, %v1790_v27  ;;  %v6140_v34 = vadd.f32 %v6056_v28, %v1791_v1  ;;  %vm1816_vm5 = vcmp.gt.f32.partialorder %v6073_v13, 0.0 }
 0x2f2   :  { %v1865_v18 = vmul.f32 1.442695, %v1840_v25  ;;  %v1867_v8 = vmul.f32 1.442695, %v1841_v21  ;;  %v1772_v55 = vmul.f32 %v6040_v3, %v1754_v15  ;;  %vm1817_vm6 = vcmp.gt.f32.partialorder %v6076_v46, 0.0 }
 0x2f3   :  { %5129 = vpow2.f32 %v1863_v44  ;;  %v1842_v22 = vmin.f32 %v6137_v32, 0.0  ;;  %v1843_v6 = vmin.f32 %v6140_v34, 0.0  ;;  %v6151_v11 = vadd.f32 %v6056_v28, %v1793_v5 }
 0x2f4   :  { %v5114_v14 = vpop.eup %5113  ;;  %5131 = vpow2.f32 %v1865_v18  ;;  %v1792_v56 = vmul.f32 %v6045_v40, %v1772_v55  ;;  %vm1818_vm8 = vcmp.gt.f32.partialorder %v6080_v47, 0.0  ;;  %vm1819_vm9 = vcmp.gt.f32.partialorder %v6083_v61, 0.0 }
 0x2f5   :  { %v5116_v16 = vpop.eup %5115  ;;  %v4114_v38 = vadd.f32 -1.0, %v5114_v14  ;;  %5133 = vpow2.f32 %v1867_v8  ;;  %v1869_v35 = vmul.f32 1.442695, %v1842_v22  ;;  %v1871_v27 = vmul.f32 1.442695, %v1843_v6 }
 0x2f6   :  { %v5118_v48 = vpop.eup %5117  ;;  %v4115_v54 = vadd.f32 -1.0, %v5116_v16  ;;  %v1845_v25 = vmin.f32 %v6151_v11, 0.0  ;;  %vm1820_vm10 = vcmp.gt.f32.partialorder %v6086_v53, 0.0  ;;  %vm1821_vm11 = vcmp.gt.f32.partialorder %v6091_v63, 0.0 }
 0x2f7   :  { %v5120_v43 = vpop.eup %5119  ;;  %v6156_v12 = vsel %vm1815_vm4, %v6070_v2, %v4114_v38  ;;  %v4116_v15 = vadd.f32 -1.0, %v5118_v48  ;;  %5135 = vpow2.f32 %v1869_v35  ;;  %vm1822_vm12 = vcmp.gt.f32.partialorder %v6103_v59, 0.0 }
 0x2f8   :  { %v5122_v26 = vpop.eup %5121  ;;  %4611 = vmatprep.mubr.msk.f32.mxu0 %vm1643_vm7, %v6156_v12  ;;  %v6163_v17 = vsel %vm1816_vm5, %v6073_v13, %v4115_v54  ;;  %v4117_v45 = vadd.f32 -1.0, %v5120_v43  ;;  %v6178_v13 = vadd.f32 %v6056_v28, %v1792_v56  ;;  %5137 = vpow2.f32 %v1871_v27 }
 0x2f9   :  { %v5124_v42 = vpop.eup %5123  ;;  %4612 = vmatmul.mubr.msk.f32.vlgmr.msra.gmra.mrb[16].mxu0 %vm1643_vm7, %v6163_v17  ;;  %v6171_v2 = vsel %vm1817_vm6, %v6076_v46, %v4116_v15  ;;  %v4118_v1 = vadd.f32 -1.0, %v5122_v26  ;;  %v1774_v46 = vmul.f32 %v6040_v3, %v1756_v62  ;;  %v1875_v36 = vmul.f32 1.442695, %v1845_v25 }
 0x2fa   :  { %v5126_v5 = vpop.eup %5125  ;;  %4614 = vmatprep.mubr.msk.f32.mxu0 %vm1643_vm7, %v6171_v2  ;;  %4874 = vmatpush3.bf16.msra.mxu0 %v5894_v29  ;;  %v6188_v21 = vsel %vm1818_vm8, %v6080_v47, %v4117_v45  ;;  %v4119_v29 = vadd.f32 -1.0, %v5124_v42  ;;  %v1844_v44 = vmin.f32 %v6178_v13, 0.0  ;;  %vm1823_vm13 = vcmp.gt.f32.partialorder %v6118_v57, 0.0 }
 0x2fb   :  { %4876 = vmatprep.subr.bf16.mxu0 %v6129_v60  ;;  %v5128_v14 = vpop.eup %5127  ;;  %v6194_v18 = vsel %vm1819_vm9, %v6083_v61, %v4118_v1  ;;  %v4120_v8 = vadd.f32 -1.0, %v5126_v5  ;;  %v1794_v58 = vmul.f32 %v6045_v40, %v1774_v46  ;;  %5139 = vpow2.f32 %v1875_v36 }
 0x2fc   :  { %v1873_v62 = vmul.f32 1.442695, %v1844_v44  ;;  %v6202_v16 = vsel %vm1820_vm10, %v6086_v53, %v4119_v29  ;;  %v4121_v61 = vadd.f32 -1.0, %v5128_v14  ;;  %vm1824_vm14 = vcmp.gt.f32.partialorder %v6121_v24, 0.0  ;;  %v3652_v44 = vld [vmem:[#allocation2 + $0x190] sm:$0xff]  ;;  %v3653_v14 = vld [vmem:[#allocation2 + $0x198] sm:$0xff] }
 0x2fd   :  { %4615 = vmatmul.mubr.msk.f32.gmra.mrb[18].mxu0 %vm1643_vm7, %v6188_v21  ;;  %v5130_v3 = vpop.eup %5129  ;;  %v1814_v47 = vadd.f32 %v6056_v28, %v1794_v58  ;;  %v6208_v40 = vsel %vm1821_vm11, %v6091_v63, %v4120_v8  ;;  %vm1825_vm15 = vcmp.gt.f32.partialorder %v6124_v52, 0.0  ;;  %vm1826_vm0 = vcmp.gt.f32.partialorder %v6137_v32, 0.0 }
 0x2fe   :  { %4617 = vmatprep.mubr.msk.f32.mxu0 %vm1643_vm7, %v6194_v18  ;;  %v5132_v55 = vpop.eup %5131  ;;  %5141 = vpow2.f32 %v1873_v62  ;;  %v4122_v22 = vadd.f32 -1.0, %v5130_v3  ;;  %v1902_v53 = vsel %vm1822_vm12, %v6103_v59, %v4121_v61  ;;  %vm1827_vm1 = vcmp.gt.f32.partialorder %v6140_v34, 0.0 }
 0x2ff   :  { %v5134_v38 = vpop.eup %5133  ;;  %v1846_v48 = vmin.f32 %v1814_v47, 0.0  ;;  %v4123_v54 = vadd.f32 -1.0, %v5132_v55  ;;  %vm1828_vm2 = vcmp.gt.f32.partialorder %v6178_v13, 0.0  ;;  %vm1829_vm3 = vcmp.gt.f32.partialorder %v6151_v11, 0.0 }
 0x300   :  { %v1903_v43 = vsel %vm1823_vm13, %v6118_v57, %v4122_v22  ;;  %v4124_v63 = vadd.f32 -1.0, %v5134_v38  ;;  %vm1830_vm4 = vcmp.gt.f32.partialorder %v1814_v47, 0.0  ;;  %vm5208_vm5 = vmmov 0  }
 0x301   :  { %4618 = vmatmul.mubr.msk.f32.gmra.mrb[20].mxu0 %vm1643_vm7, %v6202_v16  ;;  %v1877_v28 = vmul.f32 1.442695, %v1846_v48  ;;  %v5136_v6 = vpop.eup %5135  ;;  %v1904_v35 = vsel %vm1824_vm14, %v6121_v24, %v4123_v54  ;;  %4699 = vmatprep.mubr.msk.f32.mxu1 %vm5208_vm5, %v5206_v19  ;;  %v4955_v8 = vpack.c.bf16 %v3653_v14, %v3652_v44 }
 0x302   :  { %4620 = vmatprep.mubr.msk.f32.mxu0 %vm1643_vm7, %v6208_v40  ;;  %v5138_v15 = vpop.eup %5137  ;;  %v4125_v59 = vadd.f32 -1.0, %v5136_v6  ;;  %v1905_v45 = vsel %vm1825_vm15, %v6124_v52, %v4124_v63 }
 0x303   :  { %5143 = vpow2.f32 %v1877_v28  ;;  %v4126_v27 = vadd.f32 -1.0, %v5138_v15 }
 0x304   :  { %v1906_v57 = vsel %vm1826_vm0, %v6137_v32, %v4125_v59 }
 0x305   :  { %4621 = vmatmul.mubr.msk.f32.gmra.mrb[22].mxu0 %vm1643_vm7, %v1902_v53  ;;  %v5140_v26 = vpop.eup %5139  ;;  %v1907_v24 = vsel %vm1827_vm1, %v6140_v34, %v4126_v27  ;;  %v2710_v34 = vld [vmem:[#allocation2 + $0x28] sm:$0xff] }
 0x306   :  { %4623 = vmatprep.mubr.msk.f32.mxu0 %vm1643_vm7, %v1903_v43  ;;  %v4128_v1 = vadd.f32 -1.0, %v5140_v26 }
 0x308   :  { %v5142_v56 = vpop.eup %5141  ;;  %v1909_v32 = vsel %vm1829_vm3, %v6151_v11, %v4128_v1  ;;  %v2711_v11 = vld [vmem:[#allocation2 + $0x30] sm:$0xff] }
 0x309   :  { %4624 = vmatmul.mubr.msk.f32.gmra.mrb[24].mxu0 %vm1643_vm7, %v1904_v35  ;;  %v4127_v42 = vadd.f32 -1.0, %v5142_v56 }
 0x30a   :  { %4626 = vmatprep.mubr.msk.f32.mxu0 %vm1643_vm7, %v1905_v45 }
 0x30b   :  { %v1908_v52 = vsel %vm1828_vm2, %v6178_v13, %v4127_v42  ;;  %v3650_v13 = vld [vmem:[#allocation2 + $0x180] sm:$0xff] }
 0x30d   :  { %4627 = vmatmul.mubr.msk.f32.gmra.mrb[26].mxu0 %vm1643_vm7, %v1906_v57  ;;  %v5144_v5 = vpop.eup %5143 }
 0x30e   :  { %4629 = vmatprep.mubr.msk.f32.mxu0 %vm1643_vm7, %v1907_v24  ;;  %v4129_v25 = vadd.f32 -1.0, %v5144_v5 }
 0x310   :  { %v1910_v46 = vsel %vm1830_vm4, %v1814_v47, %v4129_v25 }
 0x311   :  { %4630 = vmatmul.mubr.msk.f32.gmra.mrb[28].mxu0 %vm1643_vm7, %v1908_v52 }
 0x312   :  { %4632 = vmatprep.mubr.msk.f32.mxu0 %vm1643_vm7, %v1909_v32 }
 0x315   :  { %4633 = vmatmul.mubr.msk.f32.gmra.mrb[30].mxu0 %vm1643_vm7, %v1910_v46 }
 0x316   :  { %4639 = vmatprep.mubr.f32.mxu0 %v5206_v19 }
 0x319   :  { %4640 = vmatmul.mubr.msk.f32.vlgmr.msra.gmra.mrb[16].mxu0 %vm1643_vm7, %v6156_v12  ;;  %v5207_v12 = vmov 0.0|0.0  }
 0x31a   :  { %4642 = vmatprep.mubr.msk.f32.mxu0 %vm1643_vm7, %v6163_v17  ;;  %4878 = vmatpush3.bf16.msra.mxu0 %v6129_v60  ;;  %v2709_v60 = vld [vmem:[#allocation2 + $0x20] sm:$0xff] }
 0x31b   :  { %4879 = vmatprep.subr.bf16.mxu1 %v5207_v12  ;;  %4951 = vmatprep.subr.bf16.mxu0 %v5207_v12 }
 0x31d   :  { %4643 = vmatmul.mubr.msk.f32.gmra.mrb[18].mxu0 %vm1643_vm7, %v6171_v2 }
 0x31e   :  { %4645 = vmatprep.mubr.msk.f32.mxu0 %vm1643_vm7, %v6188_v21 }
 0x321   :  { %4646 = vmatmul.mubr.msk.f32.gmra.mrb[20].mxu0 %vm1643_vm7, %v6194_v18 }
 0x322   :  { %4648 = vmatprep.mubr.msk.f32.mxu0 %vm1643_vm7, %v6202_v16 }
 0x325   :  { %4649 = vmatmul.mubr.msk.f32.gmra.mrb[22].mxu0 %vm1643_vm7, %v6208_v40 }
 0x326   :  { %4651 = vmatprep.mubr.msk.f32.mxu0 %vm1643_vm7, %v1902_v53 }
 0x329   :  { %4652 = vmatmul.mubr.msk.f32.gmra.mrb[24].mxu0 %vm1643_vm7, %v1903_v43 }
 0x32a   :  { %4654 = vmatprep.mubr.msk.f32.mxu0 %vm1643_vm7, %v1904_v35 }
 0x32d   :  { %4655 = vmatmul.mubr.msk.f32.gmra.mrb[26].mxu0 %vm1643_vm7, %v1905_v45 }
 0x32e   :  { %4657 = vmatprep.mubr.msk.f32.mxu0 %vm1643_vm7, %v1906_v57 }
 0x331   :  { %4658 = vmatmul.mubr.msk.f32.gmra.mrb[28].mxu0 %vm1643_vm7, %v1907_v24 }
 0x332   :  { %4660 = vmatprep.mubr.msk.f32.mxu0 %vm1643_vm7, %v1908_v52 }
 0x335   :  { %4661 = vmatmul.mubr.msk.f32.gmra.mrb[30].mxu0 %vm1643_vm7, %v1909_v32 }
 0x336   :  { %4667 = vmatprep.mubr.msk.f32.mxu0 %vm1643_vm7, %v6163_v17  ;;  %v4880_v17 = vpack.c.bf16 %v2710_v34, %v2709_v60 }
 0x338   :  { %4881 = vmatpush3.bf16.msra.mxu1 %v4880_v17 }
 0x339   :  { %4668 = vmatmul.mubr.msk.f32.vlgmr.msra.gmra.mrb[16].mxu0 %vm1643_vm7, %v6171_v2  ;;  %v2712_v2 = vld [vmem:[#allocation2 + $0x38] sm:$0xff]  ;;  %4882 = vmatprep.subr.bf16.mxu1 %v5207_v12 }
 0x33a   :  { %4670 = vmatprep.mubr.msk.f32.mxu0 %vm1643_vm7, %v6188_v21  ;;  %v3651_v21 = vld [vmem:[#allocation2 + $0x188] sm:$0xff] }
 0x33b   :  { %v4952_v29 = vpack.c.bf16 %v3651_v21, %v3650_v13 }
 0x33d   :  { %4671 = vmatmul.mubr.msk.f32.gmra.mrb[18].mxu0 %vm1643_vm7, %v6194_v18  ;;  %v4883_v18 = vpack.c.bf16 %v2712_v2, %v2711_v11 }
 0x33e   :  { %4673 = vmatprep.mubr.msk.f32.mxu0 %vm1643_vm7, %v6202_v16  ;;  %4953 = vmatpush3.bf16.msra.mxu0 %v4952_v29 }
 0x33f   :  { %4954 = vmatprep.subr.bf16.mxu0 %v5207_v12  ;;  %4884 = vmatpush3.bf16.msra.mxu1 %v4883_v18 }
 0x340   :  { %4885 = vmatprep.subr.bf16.mxu1 %v5207_v12 }
 0x341   :  { %4674 = vmatmul.mubr.msk.f32.gmra.mrb[20].mxu0 %vm1643_vm7, %v6208_v40 }
 0x342   :  { %4676 = vmatprep.mubr.msk.f32.mxu0 %vm1643_vm7, %v1902_v53  ;;  %4956 = vmatpush3.bf16.msra.mxu0 %v4955_v8 }
 0x343   :  { %4963 = vmatprep.subr.bf16.mxu0 %v5207_v12 }
 0x345   :  { %4677 = vmatmul.mubr.msk.f32.gmra.mrb[22].mxu0 %vm1643_vm7, %v1903_v43 }
 0x346   :  { %4679 = vmatprep.mubr.msk.f32.mxu0 %vm1643_vm7, %v1904_v35 }
 0x349   :  { %4680 = vmatmul.mubr.msk.f32.gmra.mrb[24].mxu0 %vm1643_vm7, %v1905_v45 }
 0x34a   :  { %4682 = vmatprep.mubr.msk.f32.mxu0 %vm1643_vm7, %v1906_v57 }
 0x34d   :  { %4683 = vmatmul.mubr.msk.f32.gmra.mrb[26].mxu0 %vm1643_vm7, %v1907_v24 }
 0x34e   :  { %4685 = vmatprep.mubr.msk.f32.mxu0 %vm1643_vm7, %v1908_v52 }
 0x351   :  { %4686 = vmatmul.mubr.msk.f32.gmra.mrb[28].mxu0 %vm1643_vm7, %v1909_v32 }
 0x352   :  { %4688 = vmatprep.mubr.msk.f32.mxu0 %vm1643_vm7, %v1910_v46  ;;  %vm2436_vm7 = vcmask 261120  }
 0x355   :  { %4689 = vmatmul.mubr.f32.gmra.mrb[30].mxu0 %v5206_v19 }
 0x356   :  { %4831 = vmatprep.mubr.msk.f32.mxu0 %vm5208_vm5, %v5206_v19 }
 0x40c   :  { %v6293_v36 = vpop.f32.mrb[16].mxu0 }
 0x40d   :  { %v2421_v58 = vmul.f32 %v6293_v36, %v5403_v37  ;;  %v6297_v62 = vpop.f32.mrb[17].mxu0 }
 0x40e   :  { %v2420_v3 = vmul.f32 %v5407_v41, %v6297_v62 }
 0x40f   :  { %v2438_v47 = vsel %vm2436_vm7, %v2421_v58, 0.0  ;;  %v2475_v55 = vmul.f32 %v6293_v36, %v2421_v58 }
 0x410   :  { %v2437_v16 = vsel %vm2436_vm7, %v2420_v3, 0.0  ;;  %v2474_v61 = vmul.f32 %v2420_v3, %v6297_v62  ;;  %v6305_v38 = vpop.f32.mrb[18].mxu0 }
 0x411   :  { %v2491_v40 = vsel %vm2436_vm7, %v2475_v55, 0.0  ;;  %v2439_v22 = vadd.f32 %v2438_v47, %v2437_v16  ;;  %v2423_v37 = vmul.f32 %v6305_v38, %v5418_v49  ;;  %v6310_v48 = vpop.f32.mrb[19].mxu0 }
 0x412   :  { %v2490_v41 = vsel %vm2436_vm7, %v2474_v61, 0.0  ;;  %v2422_v28 = vmul.f32 %v5421_v50, %v6310_v48 }
 0x413   :  { %v2492_v53 = vadd.f32 %v2491_v40, %v2490_v41  ;;  %v2477_v54 = vmul.f32 %v6305_v38, %v2423_v37  ;;  %v2442_v59 = vsel %vm2436_vm7, %v2423_v37, 0.0 }
 0x414   :  { %v2440_v6 = vsel %vm2436_vm7, %v2422_v28, 0.0  ;;  %v2476_v43 = vmul.f32 %v2422_v28, %v6310_v48  ;;  %v6318_v63 = vpop.f32.mrb[20].mxu0 }
 0x415   :  { %v2441_v15 = vadd.f32 %v2440_v6, %v2439_v22  ;;  %v2425_v49 = vmul.f32 %v6318_v63, %v5424_v51  ;;  %v6322_v35 = vpop.f32.mrb[21].mxu0  ;;  %v2495_v56 = vsel %vm2436_vm7, %v2477_v54, 0.0 }
 0x416   :  { %v2493_v26 = vsel %vm2436_vm7, %v2476_v43, 0.0  ;;  %v2424_v50 = vmul.f32 %v5454_v4, %v6322_v35 }
 0x417   :  { %v2494_v45 = vadd.f32 %v2493_v26, %v2492_v53  ;;  %v2443_v27 = vadd.f32 %v2442_v59, %v2441_v15  ;;  %v2479_v57 = vmul.f32 %v6318_v63, %v2425_v49  ;;  %v2446_v4 = vsel %vm2436_vm7, %v2425_v49, 0.0 }
 0x418   :  { %v2444_v42 = vsel %vm2436_vm7, %v2424_v50, 0.0  ;;  %v2478_v24 = vmul.f32 %v2424_v50, %v6322_v35  ;;  %v6332_v51 = vpop.f32.mrb[22].mxu0 }
 0x419   :  { %v2445_v1 = vadd.f32 %v2444_v42, %v2443_v27  ;;  %v2496_v5 = vadd.f32 %v2495_v56, %v2494_v45  ;;  %v2427_v52 = vmul.f32 %v6332_v51, %v5462_v7  ;;  %v6336_v25 = vpop.f32.mrb[23].mxu0  ;;  %v2499_v11 = vsel %vm2436_vm7, %v2479_v57, 0.0 }
 0x41a   :  { %v2497_v32 = vsel %vm2436_vm7, %v2478_v24, 0.0  ;;  %v2426_v46 = vmul.f32 %v5467_v9, %v6336_v25 }
 0x41b   :  { %v2498_v60 = vadd.f32 %v2497_v32, %v2496_v5  ;;  %v2447_v34 = vadd.f32 %v2446_v4, %v2445_v1  ;;  %v2481_v17 = vmul.f32 %v6332_v51, %v2427_v52  ;;  %v2450_v9 = vsel %vm2436_vm7, %v2427_v52, 0.0 }
 0x41c   :  { %v2448_v2 = vsel %vm2436_vm7, %v2426_v46, 0.0  ;;  %v2480_v13 = vmul.f32 %v2426_v46, %v6336_v25  ;;  %v6346_v7 = vpop.f32.mrb[24].mxu0 }
 0x41d   :  { %v2449_v21 = vadd.f32 %v2448_v2, %v2447_v34  ;;  %v2500_v29 = vadd.f32 %v2499_v11, %v2498_v60  ;;  %v2429_v44 = vmul.f32 %v6346_v7, %v5470_v10  ;;  %v6350_v14 = vpop.f32.mrb[25].mxu0  ;;  %v2503_v47 = vsel %vm2436_vm7, %v2481_v17, 0.0 }
 0x41e   :  { %v2501_v18 = vsel %vm2436_vm7, %v2480_v13, 0.0  ;;  %v2428_v8 = vmul.f32 %v5486_v20, %v6350_v14 }
 0x41f   :  { %v2502_v58 = vadd.f32 %v2501_v18, %v2500_v29  ;;  %v2451_v3 = vadd.f32 %v2450_v9, %v2449_v21  ;;  %v2483_v55 = vmul.f32 %v6346_v7, %v2429_v44  ;;  %v2454_v20 = vsel %vm2436_vm7, %v2429_v44, 0.0 }
 0x420   :  { %v2452_v16 = vsel %vm2436_vm7, %v2428_v8, 0.0  ;;  %v2482_v61 = vmul.f32 %v2428_v8, %v6350_v14  ;;  %v6360_v10 = vpop.f32.mrb[26].mxu0 }
 0x421   :  { %v2453_v40 = vadd.f32 %v2452_v16, %v2451_v3  ;;  %v2504_v22 = vadd.f32 %v2503_v47, %v2502_v58  ;;  %v2431_v37 = vmul.f32 %v6360_v10, %v5497_v30  ;;  %v6364_v41 = vpop.f32.mrb[27].mxu0  ;;  %v2507_v43 = vsel %vm2436_vm7, %v2483_v55, 0.0 }
 0x422   :  { %v2505_v28 = vsel %vm2436_vm7, %v2482_v61, 0.0  ;;  %v2430_v53 = vmul.f32 %v5500_v31, %v6364_v41 }
 0x423   :  { %v2506_v54 = vadd.f32 %v2505_v28, %v2504_v22  ;;  %v2455_v6 = vadd.f32 %v2454_v20, %v2453_v40  ;;  %v2485_v15 = vmul.f32 %v6360_v10, %v2431_v37  ;;  %v2458_v31 = vsel %vm2436_vm7, %v2431_v37, 0.0 }
 0x424   :  { %v2456_v49 = vsel %vm2436_vm7, %v2430_v53, 0.0  ;;  %v2484_v59 = vmul.f32 %v2430_v53, %v6364_v41  ;;  %v6374_v30 = vpop.f32.mrb[28].mxu0 }
 0x425   :  { %v2457_v26 = vadd.f32 %v2456_v49, %v2455_v6  ;;  %v2508_v50 = vadd.f32 %v2507_v43, %v2506_v54  ;;  %v2433_v45 = vmul.f32 %v6374_v30, %v5553_v33  ;;  %v6378_v27 = vpop.f32.mrb[29].mxu0  ;;  %v2511_v1 = vsel %vm2436_vm7, %v2485_v15, 0.0 }
 0x426   :  { %v2509_v56 = vsel %vm2436_vm7, %v2484_v59, 0.0  ;;  %v2432_v57 = vmul.f32 %v5562_v39, %v6378_v27 }
 0x427   :  { %v2510_v42 = vadd.f32 %v2509_v56, %v2508_v50  ;;  %v2459_v24 = vadd.f32 %v2458_v31, %v2457_v26  ;;  %v2487_v5 = vmul.f32 %v6374_v30, %v2433_v45  ;;  %v2462_v39 = vsel %vm2436_vm7, %v2433_v45, 0.0 }
 0x428   :  { %v2460_v52 = vsel %vm2436_vm7, %v2432_v57, 0.0  ;;  %v2486_v4 = vmul.f32 %v2432_v57, %v6378_v27  ;;  %v6388_v33 = vpop.f32.mrb[30].mxu0 }
 0x429   :  { %v2461_v32 = vadd.f32 %v2460_v52, %v2459_v24  ;;  %v2512_v46 = vadd.f32 %v2511_v1, %v2510_v42  ;;  %v2435_v60 = vmul.f32 %v6388_v33, %v5583_v0  ;;  %v2395_v34 = vpop.f32.mrb[31].mxu0  ;;  %v2515_v21 = vsel %vm2436_vm7, %v2487_v5, 0.0 }
 0x42a   :  { %v2513_v11 = vsel %vm2436_vm7, %v2486_v4, 0.0  ;;  %v2434_v17 = vmul.f32 %v5588_v23, %v2395_v34 }
 0x42b   :  { %v2514_v2 = vadd.f32 %v2513_v11, %v2512_v46  ;;  %v2463_v13 = vadd.f32 %v2462_v39, %v2461_v32  ;;  %v2489_v29 = vmul.f32 %v6388_v33, %v2435_v60  ;;  %v2466_v0 = vsel %vm2436_vm7, %v2435_v60, 0.0  ;;  %v6450_v46 = vld [vmem:[%s6663_s6 + $0x1] ss:$0 sm:$0xff] }
 0x42c   :  { %v2464_v44 = vsel %vm2436_vm7, %v2434_v17, 0.0  ;;  %v2488_v9 = vmul.f32 %v2434_v17, %v2395_v34 }
 0x42d   :  { %v2465_v18 = vadd.f32 %v2464_v44, %v2463_v13  ;;  %v2516_v8 = vadd.f32 %v2515_v21, %v2514_v2  ;;  %v2519_v55 = vsel %vm2436_vm7, %v2489_v29, 0.0 }
 0x42e   :  { %v2517_v58 = vsel %vm2436_vm7, %v2488_v9, 0.0 }
 0x42f   :  { %v2467_v3 = vadd.f32 %v2466_v0, %v2465_v18  ;;  %v2518_v47 = vadd.f32 %v2517_v58, %v2516_v8 }
 0x431   :  { %v2468_v23 = vrot.slane %v2467_v3, 4  ;;  %v2520_v16 = vadd.f32 %v2519_v55, %v2518_v47 }
 0x433   :  { %v2469_v61 = vadd.f32 %v2468_v23, %v2467_v3  ;;  %v2521_v40 = vrot.slane %v2520_v16, 4 }
 0x435   :  { %v2470_v22 = vrot.slane %v2469_v61, 2  ;;  %v2522_v37 = vadd.f32 %v2521_v40, %v2520_v16 }
 0x437   :  { %v2471_v20 = vadd.f32 %v2470_v22, %v2469_v61  ;;  %v2523_v28 = vrot.slane %v2522_v37, 2 }
 0x439   :  { %v2472_v53 = vrot.slane %v2471_v20, 1  ;;  %v2524_v54 = vadd.f32 %v2523_v28, %v2522_v37 }
 0x43b   :  { %v2473_v6 = vadd.f32 %v2472_v53, %v2471_v20  ;;  %v2525_v43 = vrot.slane %v2524_v54, 1 }
 0x43d   :  { %v2526_v15 = vadd.f32 %v2525_v43, %v2524_v54  ;;  %v6401_v49 = vmul.f32 0.03125, %v2473_v6 }
 0x43f   :  { %v2528_v59 = vmul.f32 0.03125, %v2526_v15  ;;  %v2529_v26 = vmul.f32 %v6401_v49, %v6401_v49  ;;  %v2548_v50 = vsub.f32 %v2395_v34, %v6401_v49  ;;  %v2535_v45 = vsub.f32 %v6293_v36, %v6401_v49 }
 0x440   :  { %v2546_v31 = vsub.f32 %v6378_v27, %v6401_v49  ;;  %v2534_v56 = vsub.f32 %v6297_v62, %v6401_v49  ;;  %v2536_v57 = vsub.f32 %v6310_v48, %v6401_v49  ;;  %v2537_v42 = vsub.f32 %v6305_v38, %v6401_v49 }
 0x441   :  { %v2530_v24 = vsub.f32 %v2528_v59, %v2529_v26  ;;  %v2538_v1 = vsub.f32 %v6322_v35, %v6401_v49  ;;  %v2539_v5 = vsub.f32 %v6318_v63, %v6401_v49  ;;  %v2540_v36 = vsub.f32 %v6336_v25, %v6401_v49 }
 0x442   :  { %v2541_v27 = vsub.f32 %v6332_v51, %v6401_v49  ;;  %v2542_v62 = vsub.f32 %v6350_v14, %v6401_v49  ;;  %v2543_v48 = vsub.f32 %v6346_v7, %v6401_v49  ;;  %v2544_v38 = vsub.f32 %v6364_v41, %v6401_v49  ;;  %v6441_v7 = vld [vmem:[%s6663_s6] ss:$0 sm:$0xff] }
 0x443   :  { %v2531_v52 = vmax.f32 %v2530_v24, 0.0  ;;  %v2545_v35 = vsub.f32 %v6360_v10, %v6401_v49  ;;  %v2547_v63 = vsub.f32 %v6374_v30, %v6401_v49  ;;  %v2549_v25 = vsub.f32 %v6388_v33, %v6401_v49  ;;  %v3809_v24 = vld [vmem:[#allocation2 + $0x1c8] sm:$0xff]  ;;  %v2863_v33 = vld [vmem:[#allocation2 + $0x58] sm:$0xff] }
 0x445   :  { %v2550_v51 = vadd.f32 1e-05, %v2531_v52 }
 0x447   :  { %5145 = vrsqrt.f32 %v2550_v51 }
 0x451   :  { %v6436_v4 = vpop.eup %5145 }
 0x452   :  { %v2566_v14 = vmul.f32 %v6436_v4, %v2548_v50  ;;  %v2553_v41 = vmul.f32 %v6436_v4, %v2535_v45  ;;  %v2564_v10 = vmul.f32 %v6436_v4, %v2546_v31  ;;  %v2552_v32 = vmul.f32 %v6436_v4, %v2534_v56  ;;  %v2704_v50 = vld [vmem:[#allocation2] sm:$0xff]  ;;  %v2705_v45 = vld [vmem:[#allocation2 + $0x8] sm:$0xff] }
 0x453   :  { %v2554_v60 = vmul.f32 %v6436_v4, %v2536_v57  ;;  %v2555_v34 = vmul.f32 %v6436_v4, %v2537_v42  ;;  %v2556_v39 = vmul.f32 %v6436_v4, %v2538_v1  ;;  %v6456_v11 = vmul.f32 %v6436_v4, %v2539_v5  ;;  %v3808_v42 = vld [vmem:[#allocation2 + $0x1c0] sm:$0xff] }
 0x454   :  { %v2586_v17 = vmul.f32 %v6441_v7, %v2566_v14  ;;  %v2573_v2 = vmul.f32 %v6441_v7, %v2553_v41  ;;  %v2584_v13 = vmul.f32 %v6441_v7, %v2564_v10  ;;  %v2572_v21 = vmul.f32 %v6441_v7, %v2552_v32  ;;  %v2706_v10 = vld [vmem:[#allocation2 + $0x10] sm:$0xff]  ;;  %v2707_v32 = vld [vmem:[#allocation2 + $0x18] sm:$0xff] }
 0x455   :  { %v2574_v58 = vmul.f32 %v6441_v7, %v2554_v60  ;;  %v6477_v22 = vmul.f32 %v6436_v4, %v2540_v36  ;;  %v6480_v37 = vmul.f32 %v6436_v4, %v2541_v27  ;;  %v2560_v20 = vmul.f32 %v6436_v4, %v2542_v62 }
 0x456   :  { %v6463_v29 = vadd.f32 %v6450_v46, %v2586_v17  ;;  %v2593_v44 = vadd.f32 %v6450_v46, %v2573_v2  ;;  %v2604_v9 = vadd.f32 %v6450_v46, %v2584_v13  ;;  %v6468_v18 = vadd.f32 %v6450_v46, %v2572_v21  ;;  %v3810_v17 = vld [vmem:[#allocation2 + $0x1d0] sm:$0xff]  ;;  %v3811_v2 = vld [vmem:[#allocation2 + $0x1d8] sm:$0xff] }
 0x457   :  { %v6474_v61 = vadd.f32 %v6450_v46, %v2574_v58  ;;  %v2561_v28 = vmul.f32 %v6436_v4, %v2543_v48  ;;  %v2575_v54 = vmul.f32 %v6441_v7, %v2555_v34  ;;  %v2562_v6 = vmul.f32 %v6436_v4, %v2544_v38 }
 0x458   :  { %v2625_v8 = vmin.f32 %v2593_v44, 0.0  ;;  %v2636_v0 = vmin.f32 %v2604_v9, 0.0  ;;  %v2624_v3 = vmin.f32 %v6468_v18, 0.0  ;;  %v2638_v47 = vmin.f32 %v6463_v29, 0.0 }
 0x459   :  { %v2626_v53 = vmin.f32 %v6474_v61, 0.0  ;;  %v2580_v43 = vmul.f32 %v6441_v7, %v2560_v20  ;;  %v2581_v15 = vmul.f32 %v6441_v7, %v2561_v28  ;;  %v2563_v59 = vmul.f32 %v6436_v4, %v2545_v35  ;;  %v2862_v20 = vld [vmem:[#allocation2 + $0x50] sm:$0xff] }
 0x45a   :  { %v2642_v55 = vmul.f32 1.442695, %v2625_v8  ;;  %v2664_v23 = vmul.f32 1.442695, %v2636_v0  ;;  %v2640_v16 = vmul.f32 1.442695, %v2624_v3  ;;  %v2582_v26 = vmul.f32 %v6441_v7, %v2562_v6 }
 0x45b   :  { %v2668_v40 = vmul.f32 1.442695, %v2638_v47  ;;  %v6492_v31 = vadd.f32 %v6450_v46, %v2580_v43  ;;  %v6495_v56 = vadd.f32 %v6450_v46, %v2581_v15  ;;  %v2583_v57 = vmul.f32 %v6441_v7, %v2563_v59  ;;  %v2860_v8 = vld [vmem:[#allocation2 + $0x40] sm:$0xff]  ;;  %v2861_v0 = vld [vmem:[#allocation2 + $0x48] sm:$0xff] }
 0x45c   :  { %5147 = vpow2.f32 %v2642_v55  ;;  %v2644_v1 = vmul.f32 1.442695, %v2626_v53  ;;  %v6499_v5 = vadd.f32 %v6450_v46, %v2575_v54  ;;  %v4886_v27 = vpack.c.bf16 %v2705_v45, %v2704_v50  ;;  %v2942_v50 = vld [vmem:[#allocation2 + $0x78] sm:$0xff] }
 0x45d   :  { %5149 = vpow2.f32 %v2664_v23  ;;  %v6502_v62 = vadd.f32 %v6450_v46, %v2582_v26  ;;  %v6505_v48 = vadd.f32 %v6450_v46, %v2583_v57  ;;  %v4964_v35 = vpack.c.bf16 %v3809_v24, %v3808_v42 }
 0x45e   :  { %5151 = vpow2.f32 %v2640_v16  ;;  %v2576_v51 = vmul.f32 %v6441_v7, %v2556_v39  ;;  %v2565_v14 = vmul.f32 %v6436_v4, %v2547_v63  ;;  %vm2609_vm6 = vcmp.gt.f32.partialorder %v2593_v44, 0.0 }
 0x45f   :  { %5153 = vpow2.f32 %v2668_v40  ;;  %v2627_v60 = vmin.f32 %v6499_v5, 0.0  ;;  %vm2620_vm8 = vcmp.gt.f32.partialorder %v2604_v9, 0.0  ;;  %v4889_v30 = vpack.c.bf16 %v2707_v32, %v2706_v10 }
 0x460   :  { %5155 = vpow2.f32 %v2644_v1  ;;  %v4967_v63 = vpack.c.bf16 %v3811_v2, %v3810_v17  ;;  %v2585_v3 = vmul.f32 %v6441_v7, %v2565_v14  ;;  %v2567_v47 = vmul.f32 %v6436_v4, %v2549_v25  ;;  %v3098_v17 = vld [vmem:[#allocation2 + $0xa8] sm:$0xff] }
 0x461   :  { %v2646_v58 = vmul.f32 1.442695, %v2627_v60  ;;  %v4892_v16 = vpack.c.bf16 %v2861_v0, %v2860_v8  ;;  %vm2608_vm9 = vcmp.gt.f32.partialorder %v6468_v18, 0.0  ;;  %v2577_v25 = vmul.f32 %v6441_v7, %v6456_v11  ;;  %v2939_v11 = vld [vmem:[#allocation2 + $0x60] sm:$0xff]  ;;  %v3177_v0 = vld [vmem:[#allocation2 + $0xc8] sm:$0xff] }
 0x462   :  { %v6530_v23 = vadd.f32 %v6450_v46, %v2585_v3  ;;  %v2587_v40 = vmul.f32 %v6441_v7, %v2567_v47  ;;  %vm2622_vm10 = vcmp.gt.f32.partialorder %v6463_v29, 0.0  ;;  %v4895_v6 = vpack.c.bf16 %v2863_v33, %v2862_v20  ;;  %v3176_v8 = vld [vmem:[#allocation2 + $0xc0] sm:$0xff]  ;;  %v3179_v47 = vld [vmem:[#allocation2 + $0xd8] sm:$0xff] }
 0x463   :  { %5157 = vpow2.f32 %v2646_v58  ;;  %v6550_v15 = vadd.f32 %v6450_v46, %v2577_v25  ;;  %vm2610_vm11 = vcmp.gt.f32.partialorder %v6474_v61, 0.0  ;;  %v2578_v57 = vmul.f32 %v6441_v7, %v6477_v22  ;;  %v3255_v33 = vld [vmem:[#allocation2 + $0xe0] sm:$0xff] }
 0x464   :  { %v6541_v28 = vadd.f32 %v6450_v46, %v2587_v40  ;;  %vm2611_vm12 = vcmp.gt.f32.partialorder %v6499_v5, 0.0  ;;  %vm2616_vm1 = vcmp.gt.f32.partialorder %v6492_v31, 0.0  ;;  %vm2617_vm2 = vcmp.gt.f32.partialorder %v6495_v56, 0.0 }
 0x465   :  { %v2629_v45 = vmin.f32 %v6550_v15, 0.0  ;;  %vm2613_vm14 = vcmp.gt.f32.partialorder %v6550_v15, 0.0  ;;  %vm2618_vm3 = vcmp.gt.f32.partialorder %v6502_v62, 0.0  ;;  %vm2619_vm4 = vcmp.gt.f32.partialorder %v6505_v48, 0.0 }
 0x466   :  { %v5148_v36 = vpop.eup %5147 }
 0x467   :  { %v5150_v38 = vpop.eup %5149  ;;  %v4183_v52 = vadd.f32 -1.0, %v5148_v36  ;;  %v3018_v36 = vld [vmem:[#allocation2 + $0x80] sm:$0xff] }
 0x468   :  { %v4194_v41 = vadd.f32 -1.0, %v5150_v38  ;;  %v5152_v13 = vpop.eup %5151  ;;  %v2650_v38 = vmul.f32 1.442695, %v2629_v45 }
 0x469   :  { %v2689_v34 = vsel %vm2609_vm6, %v2593_v44, %v4183_v52  ;;  %v5154_v21 = vpop.eup %5153  ;;  %v6517_v44 = vadd.f32 %v6450_v46, %v2576_v51  ;;  %v6563_v52 = vadd.f32 %v6450_v46, %v2578_v57  ;;  %v3021_v51 = vld [vmem:[#allocation2 + $0x98] sm:$0xff]  ;;  %v3336_v57 = vld [vmem:[#allocation2 + $0x110] sm:$0xff]  ;;  %vm2621_vm6 = vcmp.gt.f32.partialorder %v6530_v23, 0.0 }
 0x46a   :  { %4700 = vmatmul.mubr.msk.f32.vlgmr.msra.gmra.mrb[16].mxu1 %vm2436_vm7, %v2689_v34  ;;  %v2700_v39 = vsel %vm2620_vm8, %v2604_v9, %v4194_v41  ;;  %v4182_v9 = vadd.f32 -1.0, %v5152_v13  ;;  %v4196_v55 = vadd.f32 -1.0, %v5154_v21  ;;  %v5156_v53 = vpop.eup %5155  ;;  %v2579_v41 = vmul.f32 %v6441_v7, %v6480_v37  ;;  %v3097_v34 = vld [vmem:[#allocation2 + $0xa0] sm:$0xff]  ;;  %v3099_v37 = vld [vmem:[#allocation2 + $0xb0] sm:$0xff] }
 0x46b   :  { %4887 = vmatpush3.bf16.msra.mxu1 %v4886_v27  ;;  %4832 = vmatmul.mubr.msk.f32.vlgmr.msra.gmra.mrb[32].mxu0 %vm2436_vm7, %v2700_v39  ;;  %v2628_v49 = vmin.f32 %v6517_v44, 0.0  ;;  %v4184_v59 = vadd.f32 -1.0, %v5156_v53  ;;  %v3019_v27 = vld [vmem:[#allocation2 + $0x88] sm:$0xff]  ;;  %v2630_v14 = vmin.f32 %v6563_v52, 0.0  ;;  %v4910_v7 = vpack.c.bf16 %v3098_v17, %v3097_v34  ;;  %v3492_v34 = vld [vmem:[#allocation2 + $0x140] sm:$0xff] }
 0x46c   :  { %4965 = vmatpush3.bf16.msra.mxu0 %v4964_v35  ;;  %4888 = vmatprep.subr.bf16.mxu1 %v5207_v12  ;;  %v2688_v4 = vsel %vm2608_vm9, %v6468_v18, %v4182_v9  ;;  %v2702_v54 = vsel %vm2622_vm10, %v6463_v29, %v4196_v55  ;;  %v2940_v18 = vld [vmem:[#allocation2 + $0x68] sm:$0xff]  ;;  %v2941_v29 = vld [vmem:[#allocation2 + $0x70] sm:$0xff]  ;;  %v4904_v22 = vpack.c.bf16 %v3019_v27, %v3018_v36  ;;  %vm2612_vm13 = vcmp.gt.f32.partialorder %v6517_v44, 0.0 }
 0x46d   :  { %4966 = vmatprep.subr.bf16.mxu0 %v5207_v12  ;;  %4710 = vmatprep.mubr.msk.f32.mxu1 %vm5208_vm5, %v5206_v19  ;;  %v2648_v43 = vmul.f32 1.442695, %v2628_v49  ;;  %v4898_v26 = vpack.c.bf16 %v2940_v18, %v2939_v11  ;;  %v2690_v42 = vsel %vm2610_vm11, %v6474_v61, %v4184_v59  ;;  %v5158_v24 = vpop.eup %5157  ;;  %v4901_v1 = vpack.c.bf16 %v2942_v50, %v2941_v29  ;;  %v3020_v61 = vld [vmem:[#allocation2 + $0x90] sm:$0xff]  ;;  %v3256_v49 = vld [vmem:[#allocation2 + $0xe8] sm:$0xff]  ;;  %v3334_v59 = vld [vmem:[#allocation2 + $0x100] sm:$0xff] }
 0x46e   :  { %4853 = vmatprep.mubr.msk.f32.mxu0 %vm5208_vm5, %v5206_v19  ;;  %v4185_v35 = vadd.f32 -1.0, %v5158_v24  ;;  %v4907_v60 = vpack.c.bf16 %v3021_v51, %v3020_v61  ;;  %v2652_v2 = vmul.f32 1.442695, %v2630_v14  ;;  %v6576_v13 = vadd.f32 %v6450_v46, %v2579_v41  ;;  %v3415_v51 = vld [vmem:[#allocation2 + $0x130] sm:$0xff]  ;;  %v3416_v14 = vld [vmem:[#allocation2 + $0x138] sm:$0xff]  ;;  %v3493_v17 = vld [vmem:[#allocation2 + $0x148] sm:$0xff] }
 0x46f   :  { %4890 = vmatpush3.bf16.msra.mxu1 %v4889_v30  ;;  %5159 = vpow2.f32 %v2648_v43  ;;  %v4916_v9 = vpack.c.bf16 %v3177_v0, %v3176_v8  ;;  %v2632_v55 = vmin.f32 %v6492_v31, 0.0  ;;  %v4922_v53 = vpack.c.bf16 %v3256_v49, %v3255_v33 }
 0x470   :  { %4968 = vmatpush3.bf16.msra.mxu0 %v4967_v63  ;;  %4891 = vmatprep.subr.bf16.mxu1 %v5207_v12  ;;  %5161 = vpow2.f32 %v2650_v38  ;;  %v2691_v10 = vsel %vm2611_vm12, %v6499_v5, %v4185_v35  ;;  %v3100_v5 = vld [vmem:[#allocation2 + $0xb8] sm:$0xff]  ;;  %v2631_v21 = vmin.f32 %v6576_v13, 0.0  ;;  %vm2614_vm15 = vcmp.gt.f32.partialorder %v6563_v52, 0.0  ;;  %v3413_v38 = vld [vmem:[#allocation2 + $0x120] sm:$0xff] }
 0x471   :  { %5163 = vpow2.f32 %v2652_v2  ;;  %v4913_v46 = vpack.c.bf16 %v3100_v5, %v3099_v37  ;;  %v2656_v25 = vmul.f32 1.442695, %v2632_v55  ;;  %v2633_v11 = vmin.f32 %v6495_v56, 0.0 }
 0x472   :  { %4711 = vmatmul.mubr.msk.f32.vlgmr.msra.gmra.mrb[18].mxu1 %vm2436_vm7, %v2688_v4  ;;  %v2654_v58 = vmul.f32 1.442695, %v2631_v21  ;;  %vm2615_vm0 = vcmp.gt.f32.partialorder %v6576_v13, 0.0  ;;  %v2634_v24 = vmin.f32 %v6502_v62, 0.0  ;;  %v2635_v41 = vmin.f32 %v6505_v48, 0.0 }
 0x473   :  { %4854 = vmatmul.mubr.msk.f32.vlgmr.msra.gmra.mrb[34].mxu0 %vm2436_vm7, %v2702_v54  ;;  %4893 = vmatpush3.bf16.msra.mxu1 %v4892_v16  ;;  %v3257_v54 = vld [vmem:[#allocation2 + $0xf0] sm:$0xff]  ;;  %v2658_v29 = vmul.f32 1.442695, %v2633_v11  ;;  %v2637_v37 = vmin.f32 %v6530_v23, 0.0  ;;  %v3888_v11 = vld [vmem:[#allocation2 + $0x1e8] sm:$0xff]  ;;  %vm2623_vm8 = vcmp.gt.f32.partialorder %v6541_v28, 0.0 }
 0x474   :  { %4894 = vmatprep.subr.bf16.mxu1 %v5207_v12  ;;  %4721 = vmatprep.mubr.msk.f32.mxu1 %vm5208_vm5, %v5206_v19  ;;  %5165 = vpow2.f32 %v2654_v58  ;;  %v2660_v35 = vmul.f32 1.442695, %v2634_v24  ;;  %v2662_v2 = vmul.f32 1.442695, %v2635_v41 }
 0x475   :  { %5167 = vpow2.f32 %v2656_v25  ;;  %v2666_v8 = vmul.f32 1.442695, %v2637_v37  ;;  %v3732_v25 = vld [vmem:[#allocation2 + $0x1b8] sm:$0xff] }
 0x476   :  { %5169 = vpow2.f32 %v2658_v29 }
 0x477   :  { %4896 = vmatpush3.bf16.msra.mxu1 %v4895_v6  ;;  %v3258_v6 = vld [vmem:[#allocation2 + $0xf8] sm:$0xff]  ;;  %5171 = vpow2.f32 %v2660_v35 }
 0x478   :  { %4897 = vmatprep.subr.bf16.mxu1 %v5207_v12  ;;  %5173 = vpow2.f32 %v2662_v2 }
 0x479   :  { %v5160_v32 = vpop.eup %5159  ;;  %5175 = vpow2.f32 %v2666_v8 }
 0x47a   :  { %4722 = vmatmul.mubr.msk.f32.vlgmr.msra.gmra.mrb[20].mxu1 %vm2436_vm7, %v2690_v42  ;;  %v4186_v39 = vadd.f32 -1.0, %v5160_v32  ;;  %v5162_v63 = vpop.eup %5161  ;;  %v3337_v42 = vld [vmem:[#allocation2 + $0x118] sm:$0xff] }
 0x47b   :  { %4899 = vmatpush3.bf16.msra.mxu1 %v4898_v26  ;;  %4732 = vmatprep.mubr.msk.f32.mxu1 %vm5208_vm5, %v5206_v19  ;;  %v4187_v3 = vadd.f32 -1.0, %v5162_v63  ;;  %v5164_v40 = vpop.eup %5163  ;;  %v3335_v26 = vld [vmem:[#allocation2 + $0x108] sm:$0xff]  ;;  %v4931_v27 = vpack.c.bf16 %v3337_v42, %v3336_v57  ;;  %v3571_v63 = vld [vmem:[#allocation2 + $0x160] sm:$0xff] }
 0x47c   :  { %4900 = vmatprep.subr.bf16.mxu1 %v5207_v12  ;;  %v2692_v30 = vsel %vm2612_vm13, %v6517_v44, %v4186_v39  ;;  %v3178_v44 = vld [vmem:[#allocation2 + $0xd0] sm:$0xff]  ;;  %v4188_v4 = vadd.f32 -1.0, %v5164_v40  ;;  %v4928_v45 = vpack.c.bf16 %v3335_v26, %v3334_v59  ;;  %v4940_v39 = vpack.c.bf16 %v3493_v17, %v3492_v34  ;;  %v3730_v40 = vld [vmem:[#allocation2 + $0x1a8] sm:$0xff] }
 0x47d   :  { %v2693_v16 = vsel %vm2613_vm14, %v6550_v15, %v4187_v3  ;;  %v4919_v20 = vpack.c.bf16 %v3179_v47, %v3178_v44  ;;  %v4925_v15 = vpack.c.bf16 %v3258_v6, %v3257_v54  ;;  %v3574_v3 = vld [vmem:[#allocation2 + $0x178] sm:$0xff]  ;;  %v3887_v6 = vld [vmem:[#allocation2 + $0x1e0] sm:$0xff] }
 0x47e   :  { %v2694_v18 = vsel %vm2614_vm15, %v6563_v52, %v4188_v4  ;;  %v5166_v43 = vpop.eup %5165  ;;  %v3414_v52 = vld [vmem:[#allocation2 + $0x128] sm:$0xff] }
 0x47f   :  { %4902 = vmatpush3.bf16.msra.mxu1 %v4901_v1  ;;  %v4189_v50 = vadd.f32 -1.0, %v5166_v43  ;;  %v5168_v36 = vpop.eup %5167  ;;  %v4934_v61 = vpack.c.bf16 %v3414_v52, %v3413_v38  ;;  %v4970_v43 = vpack.c.bf16 %v3888_v11, %v3887_v6 }
 0x480   :  { %4903 = vmatprep.subr.bf16.mxu1 %v5207_v12  ;;  %v5170_v32 = vpop.eup %5169 }
 0x481   :  { %v2695_v1 = vsel %vm2615_vm0, %v6576_v13, %v4189_v50  ;;  %v4191_v13 = vadd.f32 -1.0, %v5170_v32  ;;  %v5172_v21 = vpop.eup %5171 }
 0x482   :  { %4733 = vmatmul.mubr.msk.f32.vlgmr.msra.gmra.mrb[22].mxu1 %vm2436_vm7, %v2691_v10  ;;  %v4192_v0 = vadd.f32 -1.0, %v5172_v21  ;;  %v5174_v47 = vpop.eup %5173 }
 0x483   :  { %4905 = vmatpush3.bf16.msra.mxu1 %v4904_v22  ;;  %4743 = vmatprep.mubr.msk.f32.mxu1 %vm5208_vm5, %v5206_v19  ;;  %v4190_v22 = vadd.f32 -1.0, %v5168_v36  ;;  %v2697_v5 = vsel %vm2617_vm2, %v6495_v56, %v4191_v13  ;;  %v3573_v56 = vld [vmem:[#allocation2 + $0x170] sm:$0xff]  ;;  %v4193_v33 = vadd.f32 -1.0, %v5174_v47 }
 0x484   :  { %4906 = vmatprep.subr.bf16.mxu1 %v5207_v12  ;;  %v2698_v44 = vsel %vm2618_vm3, %v6502_v62, %v4192_v0  ;;  %v4949_v55 = vpack.c.bf16 %v3574_v3, %v3573_v56  ;;  %v3731_v62 = vld [vmem:[#allocation2 + $0x1b0] sm:$0xff] }
 0x485   :  { %v2696_v10 = vsel %vm2616_vm1, %v6492_v31, %v4190_v22  ;;  %v3494_v31 = vld [vmem:[#allocation2 + $0x150] sm:$0xff]  ;;  %v2699_v4 = vsel %vm2619_vm4, %v6505_v48, %v4193_v33  ;;  %v4961_v54 = vpack.c.bf16 %v3732_v25, %v3731_v62 }
 0x486   :  { %v3889_v48 = vld [vmem:[#allocation2 + $0x1f0] sm:$0xff] }
 0x487   :  { %4908 = vmatpush3.bf16.msra.mxu1 %v4907_v60  ;;  %v4937_v60 = vpack.c.bf16 %v3416_v14, %v3415_v51 }
 0x488   :  { %4909 = vmatprep.subr.bf16.mxu1 %v5207_v12 }
 0x48a   :  { %4744 = vmatmul.mubr.msk.f32.vlgmr.msra.gmra.mrb[24].mxu1 %vm2436_vm7, %v2692_v30 }
 0x48b   :  { %4911 = vmatpush3.bf16.msra.mxu1 %v4910_v7  ;;  %4754 = vmatprep.mubr.msk.f32.mxu1 %vm5208_vm5, %v5206_v19  ;;  %v3495_v7 = vld [vmem:[#allocation2 + $0x158] sm:$0xff] }
 0x48c   :  { %4912 = vmatprep.subr.bf16.mxu1 %v5207_v12  ;;  %v4943_v30 = vpack.c.bf16 %v3495_v7, %v3494_v31 }
 0x48f   :  { %4914 = vmatpush3.bf16.msra.mxu1 %v4913_v46  ;;  %v3572_v46 = vld [vmem:[#allocation2 + $0x168] sm:$0xff] }
 0x490   :  { %4915 = vmatprep.subr.bf16.mxu1 %v5207_v12  ;;  %v4946_v58 = vpack.c.bf16 %v3572_v46, %v3571_v63 }
 0x492   :  { %4755 = vmatmul.mubr.msk.f32.vlgmr.msra.gmra.mrb[26].mxu1 %vm2436_vm7, %v2693_v16  ;;  %v3729_v16 = vld [vmem:[#allocation2 + $0x1a0] sm:$0xff] }
 0x493   :  { %4917 = vmatpush3.bf16.msra.mxu1 %v4916_v9  ;;  %4765 = vmatprep.mubr.msk.f32.mxu1 %vm5208_vm5, %v5206_v19  ;;  %v2639_v9 = vmin.f32 %v6541_v28, 0.0  ;;  %v4958_v49 = vpack.c.bf16 %v3730_v40, %v3729_v16 }
 0x494   :  { %4918 = vmatprep.subr.bf16.mxu1 %v5207_v12 }
 0x497   :  { %4920 = vmatpush3.bf16.msra.mxu1 %v4919_v20  ;;  %v2670_v20 = vmul.f32 1.442695, %v2639_v9 }
 0x498   :  { %4921 = vmatprep.subr.bf16.mxu1 %v5207_v12 }
 0x499   :  { %5177 = vpow2.f32 %v2670_v20  ;;  %v4214_v20 = vld [vmem:[%s6665_s8] ss:$0 sm:$0xff] }
 0x49a   :  { %4766 = vmatmul.mubr.msk.f32.vlgmr.msra.gmra.mrb[28].mxu1 %vm2436_vm7, %v2694_v18 }
 0x49b   :  { %4923 = vmatpush3.bf16.msra.mxu1 %v4922_v53  ;;  %4776 = vmatprep.mubr.msk.f32.mxu1 %vm5208_vm5, %v5206_v19  ;;  %v5176_v53 = vpop.eup %5175 }
 0x49c   :  { %4924 = vmatprep.subr.bf16.mxu1 %v5207_v12  ;;  %v4195_v18 = vadd.f32 -1.0, %v5176_v53 }
 0x49e   :  { %v2701_v59 = vsel %vm2621_vm6, %v6530_v23, %v4195_v18 }
 0x49f   :  { %4926 = vmatpush3.bf16.msra.mxu1 %v4925_v15  ;;  %v3890_v15 = vld [vmem:[#allocation2 + $0x1f8] sm:$0xff] }
 0x4a0   :  { %4927 = vmatprep.subr.bf16.mxu1 %v5207_v12  ;;  %v4973_v29 = vpack.c.bf16 %v3890_v15, %v3889_v48 }
 0x4a2   :  { %4777 = vmatmul.mubr.msk.f32.vlgmr.msra.gmra.mrb[30].mxu1 %vm2436_vm7, %v2695_v1 }
 0x4a3   :  { %4929 = vmatpush3.bf16.msra.mxu1 %v4928_v45  ;;  %4787 = vmatprep.mubr.msk.f32.mxu1 %vm5208_vm5, %v5206_v19  ;;  %v5178_v26 = vpop.eup %5177 }
 0x4a4   :  { %4930 = vmatprep.subr.bf16.mxu1 %v5207_v12  ;;  %v4197_v50 = vadd.f32 -1.0, %v5178_v26 }
 0x4a6   :  { %v2703_v45 = vsel %vm2623_vm8, %v6541_v28, %v4197_v50 }
 0x4a7   :  { %4932 = vmatpush3.bf16.msra.mxu1 %v4931_v27 }
 0x4a8   :  { %4933 = vmatprep.subr.bf16.mxu1 %v5207_v12 }
 0x4aa   :  { %4788 = vmatmul.mubr.msk.f32.vlgmr.msra.gmra.mrb[32].mxu1 %vm2436_vm7, %v2696_v10 }
 0x4ab   :  { %4935 = vmatpush3.bf16.msra.mxu1 %v4934_v61  ;;  %4798 = vmatprep.mubr.msk.f32.mxu1 %vm5208_vm5, %v5206_v19 }
 0x4ac   :  { %4936 = vmatprep.subr.bf16.mxu1 %v5207_v12 }
 0x4af   :  { %4938 = vmatpush3.bf16.msra.mxu1 %v4937_v60 }
 0x4b0   :  { %4939 = vmatprep.subr.bf16.mxu1 %v5207_v12 }
 0x4b2   :  { %4799 = vmatmul.mubr.msk.f32.vlgmr.msra.gmra.mrb[34].mxu1 %vm2436_vm7, %v2697_v5 }
 0x4b3   :  { %4941 = vmatpush3.bf16.msra.mxu1 %v4940_v39  ;;  %4809 = vmatprep.mubr.msk.f32.mxu1 %vm5208_vm5, %v5206_v19 }
 0x4b4   :  { %4942 = vmatprep.subr.bf16.mxu1 %v5207_v12 }
 0x4b7   :  { %4944 = vmatpush3.bf16.msra.mxu1 %v4943_v30 }
 0x4b8   :  { %4945 = vmatprep.subr.bf16.mxu1 %v5207_v12 }
 0x4ba   :  { %4810 = vmatmul.mubr.msk.f32.vlgmr.msra.gmra.mrb[36].mxu1 %vm2436_vm7, %v2698_v44 }
 0x4bb   :  { %4947 = vmatpush3.bf16.msra.mxu1 %v4946_v58  ;;  %4820 = vmatprep.mubr.msk.f32.mxu1 %vm5208_vm5, %v5206_v19 }
 0x4bc   :  { %4948 = vmatprep.subr.bf16.mxu1 %v5207_v12 }
 0x4bf   :  { %4950 = vmatpush3.bf16.msra.mxu1 %v4949_v55 }
 0x4c0   :  { %4957 = vmatprep.subr.bf16.mxu1 %v5207_v12 }
 0x4c2   :  { %4821 = vmatmul.mubr.msk.f32.vlgmr.msra.gmra.mrb[38].mxu1 %vm2436_vm7, %v2699_v4 }
 0x4c3   :  { %4959 = vmatpush3.bf16.msra.mxu1 %v4958_v49  ;;  %4842 = vmatprep.mubr.msk.f32.mxu1 %vm5208_vm5, %v5206_v19 }
 0x4c4   :  { %4960 = vmatprep.subr.bf16.mxu1 %v5207_v12 }
 0x4c7   :  { %4962 = vmatpush3.bf16.msra.mxu1 %v4961_v54 }
 0x4c8   :  { %4969 = vmatprep.subr.bf16.mxu1 %v5207_v12 }
 0x4ca   :  { %4843 = vmatmul.mubr.msk.f32.vlgmr.msra.gmra.mrb[40].mxu1 %vm2436_vm7, %v2701_v59 }
 0x4cb   :  { %4971 = vmatpush3.bf16.msra.mxu1 %v4970_v43  ;;  %4864 = vmatprep.mubr.msk.f32.mxu1 %vm5208_vm5, %v5206_v19 }
 0x4cc   :  { %4972 = vmatprep.subr.bf16.mxu1 %v5207_v12 }
 0x4cf   :  { %4974 = vmatpush3.bf16.msra.mxu1 %v4973_v29 }
 0x4d2   :  { %4865 = vmatmul.mubr.msk.f32.vlgmr.msra.gmra.mrb[42].mxu1 %vm2436_vm7, %v2703_v45 }
 0x53d   :  { %v2782_v57 = vpop.f32.mrb[16].mxu1 }
 0x53e   :  { %v3723_v23 = vpop.f32.mrb[32].mxu0  ;;  %v4701_v42 = vpop.f32.mrb[17].mxu1 }
 0x53f   :  { %v4833_v24 = vpop.f32.mrb[33].mxu0 }
 0x545   :  { %v2855_v1 = vpop.f32.mrb[18].mxu1 }
 0x546   :  { %v2856_v36 = vadd.f32 %v2855_v1, %v2782_v57  ;;  %v3881_v27 = vpop.f32.mrb[34].mxu0  ;;  %v4712_v38 = vpop.f32.mrb[19].mxu1 }
 0x547   :  { %v4855_v52 = vpop.f32.mrb[35].mxu0 }
 0x54d   :  { %v2933_v19 = vpop.f32.mrb[20].mxu1 }
 0x54e   :  { %v2937_v35 = vadd.f32 %v2933_v19, %v2856_v36  ;;  %v4723_v12 = vpop.f32.mrb[21].mxu1 }
 0x555   :  { %v3012_v22 = vpop.f32.mrb[22].mxu1 }
 0x556   :  { %v3016_v61 = vadd.f32 %v3012_v22, %v2937_v35  ;;  %v4734_v51 = vpop.f32.mrb[23].mxu1 }
 0x55d   :  { %v3091_v14 = vpop.f32.mrb[24].mxu1 }
 0x55e   :  { %v3095_v41 = vadd.f32 %v3091_v14, %v3016_v61  ;;  %v4745_v28 = vpop.f32.mrb[25].mxu1 }
 0x565   :  { %v3170_v10 = vpop.f32.mrb[26].mxu1 }
 0x566   :  { %v3174_v32 = vadd.f32 %v3170_v10, %v3095_v41  ;;  %v4756_v60 = vpop.f32.mrb[27].mxu1 }
 0x56d   :  { %v3249_v34 = vpop.f32.mrb[28].mxu1 }
 0x56e   :  { %v3253_v17 = vadd.f32 %v3249_v34, %v3174_v32  ;;  %v4767_v2 = vpop.f32.mrb[29].mxu1 }
 0x575   :  { %v3328_v13 = vpop.f32.mrb[30].mxu1 }
 0x576   :  { %v3332_v39 = vadd.f32 %v3328_v13, %v3253_v17  ;;  %v4778_v31 = vpop.f32.mrb[31].mxu1 }
 0x57d   :  { %v3407_v7 = vpop.f32.mrb[32].mxu1 }
 0x57e   :  { %v3411_v37 = vadd.f32 %v3407_v7, %v3332_v39  ;;  %v4789_v5 = vpop.f32.mrb[33].mxu1 }
 0x585   :  { %v3486_v21 = vpop.f32.mrb[34].mxu1 }
 0x586   :  { %v3490_v30 = vadd.f32 %v3486_v21, %v3411_v37  ;;  %v4800_v63 = vpop.f32.mrb[35].mxu1 }
 0x58d   :  { %v3565_v46 = vpop.f32.mrb[36].mxu1 }
 0x58e   :  { %v3569_v8 = vadd.f32 %v3565_v46, %v3490_v30  ;;  %v4811_v0 = vpop.f32.mrb[37].mxu1 }
 0x595   :  { %v3644_v58 = vpop.f32.mrb[38].mxu1 }
 0x596   :  { %v3648_v56 = vadd.f32 %v3644_v58, %v3569_v8  ;;  %v4822_v3 = vpop.f32.mrb[39].mxu1 }
 0x598   :  { %v3727_v9 = vadd.f32 %v3723_v23, %v3648_v56 }
 0x59d   :  { %v3802_v44 = vpop.f32.mrb[40].mxu1 }
 0x59e   :  { %v3806_v47 = vadd.f32 %v3802_v44, %v3727_v9  ;;  %v4844_v55 = vpop.f32.mrb[41].mxu1 }
 0x5a0   :  { %v3885_v16 = vadd.f32 %v3881_v27, %v3806_v47 }
 0x5a5   :  { %v3960_v40 = vpop.f32.mrb[42].mxu1 }
 0x5a6   :  { %v3964_v33 = vadd.f32 %v3960_v40, %v3885_v16  ;;  %v4866_v49 = vpop.f32.mrb[43].mxu1 }
 0x5a8   :  { %v3972_v62 = vadd.f32 %v4214_v20, %v3964_v33 }
 0x5aa   :  { %3973 = vst [vmem:[%s6666_s9] sm:$0xff] %v3972_v62 }
 0x5ab   :  { %3978 = vsyncpa [#allocation3], 1 }

</bundles_post_ra>
